<compile_context>
chip_gen: v6e
topology: v6e:2x2x1
jax: 0.10.0
libtpu: 0.0.40
codegen_flags: <defaults>
</compile_context>

<pallas_src>
import functools

import numpy as np

import jax
import jax.numpy as jnp
from jax.experimental import pallas as pl
from jax.experimental.pallas import tpu as pltpu


# ---------------- Fused Pallas kernel (hot path) ------------------------------

def _mapblock_fused_kernel(p_ref, w1_ref, b1_ref, w2_ref, b2_ref, o_ref, a1s_ref,
                           *, hp, wp):
    """Fused conv1+BN+LeakyReLU -> conv2+bias -> 2x2 max-pool for ONE image.

    p_ref   : (1, 16*hp*wp, 9*Cin) bf16  im2col'd conv1 patches; rows ordered
                                         (parity plane ri,ci | coarse u,v) so the
                                         stage-1 result scatters into the factor-4
                                         space-to-depth scratch with plain slices.
    w1_ref  : (9*Cin, Cout)        bf16  conv1 weights, BN scale folded in (resident)
    b1_ref  : (1, Cout)            f32   conv1 bias + BN shift, folded (resident)
    w2_ref  : (9, Cout, Cout)      bf16  conv2 weights, tap-major (resident)
    b2_ref  : (1, Cout)            f32   conv2 bias (resident)
    o_ref   : (1, hp*wp, Cout)     f32   pooled output pixels (row-major)
    a1s_ref : (16, hp+1, wp+1, Cout) bf16 VMEM scratch: stage-1 activations in
                                         16-parity-plane layout incl. conv2 zero pad.
    """
    cout = o_ref.shape[-1]

    # ---- stage 1: ONE MXU pass over every conv1 output pixel of the image ----
    a1 = jnp.dot(p_ref[0], w1_ref[...], preferred_element_type=jnp.float32)
    a1 = a1 + b1_ref[...]                       # folded conv1 bias + BN affine (f32)
    a1 = jnp.where(a1 > 0, a1, 0.2 * a1)        # LeakyReLU(0.2), f32 epilogue
    a1 = a1.astype(a1s_ref.dtype)

    # ---- scatter into the conv2-padded, factor-4 space-to-depth scratch ------
    a1s_ref[...] = jnp.zeros(a1s_ref.shape, a1s_ref.dtype)   # zeros = conv2 padding
    for p in range(16):                         # 16 parity planes, static unroll
        ri, ci = p // 4, p % 4
        r0 = 1 if ri == 0 else 0                # valid coarse-row offset of this plane
        c0 = 1 if ci == 0 else 0
        base = p * hp * wp
        for u in range(hp):                     # per-row 2-D stores (no reshape)
            a1s_ref[p, r0 + u, c0:c0 + wp, :] = a1[base + u * wp: base + (u + 1) * wp]

    # ---- stage 2: conv3x3/s2 + bias per pool member, then 2x2 max ------------
    bias2 = b2_ref[...]
    pooled = None
    for a in range(2):                          # pool-window row member
        for b in range(2):                      # pool-window col member
            acc = jnp.zeros((hp * wp, cout), jnp.float32)
            for i in range(3):                  # conv2 taps: every read below is a
                for j in range(3):              # static, contiguous slice of one plane
                    qr, qc = 2 * a + i, 2 * b + j
                    plane = (qr % 4) * 4 + (qc % 4)
                    act = a1s_ref[plane,
                                  qr // 4: qr // 4 + hp,
                                  qc // 4: qc // 4 + wp, :]       # (hp, wp, Cout)
                    acc = acc + jnp.dot(act.reshape(hp * wp, cout),
                                        w2_ref[3 * i + j],
                                        preferred_element_type=jnp.float32)
            acc = acc + bias2
            pooled = acc if pooled is None else jnp.maximum(pooled, acc)

    o_ref[0] = pooled.astype(o_ref.dtype)       # single store per grid step


# ---------------- Wrapper -----------------------------------------------------

@jax.jit
def map_block_forward(x_nchw, params):
    eps = 1e-5
    N, Cin, H, W = x_nchw.shape
    Cout = params["w1"].shape[-1]
    # All intermediate spatial sizes must stay even (PyTorch MaxPool2d(2,2) floors
    # odd sizes); guard explicitly instead of silently changing semantics.
    assert H % 8 == 0 and W % 8 == 0, "MapBlock Pallas kernel expects H, W % 8 == 0"
    H1, W1 = H // 2, W // 2              # conv1 output
    HP, WP = H1 // 4, W1 // 4            # conv2 + pool output
    A2, B2 = HP + 1, WP + 1              # conv2-padded coarse grid (factor-4 planes)

    x = jnp.transpose(x_nchw, (0, 2, 3, 1)).astype(jnp.float32)      # NHWC
    xp = jnp.pad(x, ((0, 0), (1, 1), (1, 1), (0, 0)))

    # conv1 im2col: concatenate the 9 taps into the contraction dim (K = 9*Cin).
    taps = [xp[:, ki::2, kj::2, :][:, :H1, :W1, :]
            for ki in range(3) for kj in range(3)]
    patches = jnp.concatenate(taps, axis=-1)                         # (N, H1, W1, 9*Cin)

    # Reorder conv1-output pixels into the factor-4 parity-plane order used by the
    # fused conv2+pool stage: plane p holds pixels oh = 4*(u + [p==0]) + p - 1.
    def _plane_idx(n_coarse):
        p = np.arange(4)[:, None]
        return 4 * (np.arange(n_coarse)[None, :] + (p == 0).astype(np.int64)) + p - 1
    oh_idx = _plane_idx(HP)                                           # (4, HP)
    ow_idx = _plane_idx(WP)                                           # (4, WP)
    patches = patches[:, oh_idx[:, None, :, None], ow_idx[None, :, None, :], :]
    patches = patches.reshape(N, 16 * HP * WP, 9 * Cin).astype(jnp.bfloat16)

    # Fold eval-mode BatchNorm into conv1: scale -> weights (fold in f32, then cast),
    # shift -> bias; kernel epilogue is just bias-add + LeakyReLU.
    scale = params["gamma"] / jnp.sqrt(params["running_var"] + eps)
    w1f = (params["w1"].astype(jnp.float32) * scale).reshape(9 * Cin, Cout)
    w1f = w1f.astype(jnp.bfloat16)
    b1f = (params["b1"] - params["running_mean"]) * scale + params["beta"]
    b1f = b1f.reshape(1, Cout).astype(jnp.float32)

    w2m = params["w2"].astype(jnp.float32).reshape(9, Cout, Cout).astype(jnp.bfloat16)
    b2 = params["b2"].reshape(1, Cout).astype(jnp.float32)

    y = pl.pallas_call(
        functools.partial(_mapblock_fused_kernel, hp=HP, wp=WP),
        out_shape=jax.ShapeDtypeStruct((N, HP * WP, Cout), jnp.float32),
        grid=(N,),                                                     # even -> both v7x TCs
        in_specs=[
            pl.BlockSpec((1, 16 * HP * WP, 9 * Cin), lambda g: (g, 0, 0)),
            pl.BlockSpec((9 * Cin, Cout), lambda g: (0, 0)),           # resident weights
            pl.BlockSpec((1, Cout), lambda g: (0, 0)),                 # resident bias
            pl.BlockSpec((9, Cout, Cout), lambda g: (0, 0, 0)),        # resident weights
            pl.BlockSpec((1, Cout), lambda g: (0, 0)),                 # resident bias
        ],
        out_specs=pl.BlockSpec((1, HP * WP, Cout), lambda g: (g, 0, 0)),
        scratch_shapes=[pltpu.VMEM((16, A2, B2, Cout), jnp.bfloat16)],
        compiler_params=pltpu.CompilerParams(
            dimension_semantics=("parallel",),
            # 48 MiB: above the v5e(16)/v6e(32) scoped defaults, below v7x's
            # 64 MiB physical VMEM; actual usage here is well under 1 MiB.
            vmem_limit_bytes=48 * 1024 * 1024),
    )(patches, w1f, b1f, w2m, b2)

    return jnp.transpose(y.reshape(N, HP, WP, Cout), (0, 3, 1, 2))     # NCHW


# ---------------- Pure-JAX reference (for correctness check) -----------------

def reference_forward(x_nchw, params):
    eps = 1e-5
    x = jnp.transpose(x_nchw, (0, 2, 3, 1)).astype(jnp.float32)

    def conv(inp, w, b):
        y = jax.lax.conv_general_dilated(
            inp, w, window_strides=(2, 2), padding=((1, 1), (1, 1)),
            dimension_numbers=("NHWC", "HWIO", "NHWC"),
            precision=jax.lax.Precision.HIGHEST)
        return y + b

    y = conv(x, params["w1"], params["b1"])
    scale = params["gamma"] / jnp.sqrt(params["running_var"] + eps)
    y = (y - params["running_mean"]) * scale + params["beta"]
    y = jnp.where(y > 0, y, 0.2 * y)
    y = conv(y, params["w2"], params["b2"])
    y = jax.lax.reduce_window(y, -jnp.inf, jax.lax.max,
                              (1, 2, 2, 1), (1, 2, 2, 1), "VALID")
    return jnp.transpose(y, (0, 3, 1, 2))


# ---------------- Main --------------------------------------------------------

if __name__ == "__main__":
    key = jax.random.PRNGKey(0)
    ks = jax.random.split(key, 9)

    N, Cin, H, W = 2, 4, 16, 16
    Cout = 16

    # Deterministic synthetic parameters (shapes follow MapBlock.__init__);
    # conv weights stored HWIO (torch OIHW weight <-> transpose(2,3,1,0)).
    params = {
        "w1": 0.1 * jax.random.normal(ks[0], (3, 3, Cin, Cout), jnp.float32),
        "b1": 0.1 * jax.random.normal(ks[1], (Cout,), jnp.float32),
        "gamma": 1.0 + 0.1 * jax.random.normal(ks[2], (Cout,), jnp.float32),
        "beta": 0.1 * jax.random.normal(ks[3], (Cout,), jnp.float32),
        "running_mean": 0.1 * jax.random.normal(ks[4], (Cout,), jnp.float32),
        "running_var": 0.5 + jax.random.uniform(ks[5], (Cout,), jnp.float32),
        "w2": 0.1 * jax.random.normal(ks[6], (3, 3, Cout, Cout), jnp.float32),
        "b2": 0.1 * jax.random.normal(ks[7], (Cout,), jnp.float32),
    }
    x = jax.random.normal(ks[8], (N, Cin, H, W), jnp.float32)  # NCHW input

    out = jax.block_until_ready(map_block_forward(x, params))
    ref = jax.block_until_ready(reference_forward(x, params))

    assert out.shape == (N, Cout, H // 8, W // 8), out.shape
    # bf16 streaming operands + bf16 stage-1 intermediate, f32 accumulation
    # -> 2e-2 tolerance vs. the f32 HIGHEST-precision reference.
    max_err = float(jnp.max(jnp.abs(out - ref)))
    assert jnp.allclose(out, ref, rtol=2e-2, atol=2e-2), max_err
    print("KERNEL_OK")
</pallas_src>

<mosaic_0001>
module attributes {stable_mosaic.version = 11 : i64} {
  func.func @_mapblock_fused_kernel(%arg0: i32, %arg1: memref<1x64x36xbf16, #tpu.memory_space<vmem>>, %arg2: memref<36x16xbf16, #tpu.memory_space<vmem>>, %arg3: memref<1x16xf32, #tpu.memory_space<vmem>>, %arg4: memref<9x16x16xbf16, #tpu.memory_space<vmem>>, %arg5: memref<1x16xf32, #tpu.memory_space<vmem>>, %arg6: memref<1x4x16xf32, #tpu.memory_space<vmem>>, %arg7: memref<16x3x3x16xbf16, #tpu.memory_space<vmem>>) attributes {dimension_semantics = [#tpu.dimension_semantics<parallel>], iteration_bounds = array<i64: 2>, scalar_prefetch = 0 : i64, scratch_operands = 1 : i64, tpu.core_type = #tpu.core_type<tc>, window_params = [{transform_indices = @transform_0, window_bounds = array<i64: 1, 64, 36>}, {pipeline_mode = #tpu.pipeline_mode<synchronous>, transform_indices = @transform_1, window_bounds = array<i64: 36, 16>}, {pipeline_mode = #tpu.pipeline_mode<synchronous>, transform_indices = @transform_2, window_bounds = array<i64: 1, 16>}, {pipeline_mode = #tpu.pipeline_mode<synchronous>, transform_indices = @transform_3, window_bounds = array<i64: 9, 16, 16>}, {pipeline_mode = #tpu.pipeline_mode<synchronous>, transform_indices = @transform_4, window_bounds = array<i64: 1, 16>}, {transform_indices = @transform_5, window_bounds = array<i64: 1, 4, 16>}]} {
    %c0 = arith.constant 0 : index
    %c0_0 = arith.constant 0 : index
    %c0_1 = arith.constant 0 : index
    %0 = vector.load %arg1[%c0, %c0_0, %c0_1] : memref<1x64x36xbf16, #tpu.memory_space<vmem>>, vector<1x64x36xbf16>
    %1 = vector.shape_cast %0 : vector<1x64x36xbf16> to vector<64x36xbf16>
    %c0_2 = arith.constant 0 : index
    %c0_3 = arith.constant 0 : index
    %2 = vector.load %arg2[%c0_2, %c0_3] : memref<36x16xbf16, #tpu.memory_space<vmem>>, vector<36x16xbf16>
    %cst = arith.constant dense<0.000000e+00> : vector<64x16xf32>
    %3 = tpu.matmul %1, %2, %cst {dimension_numbers = #tpu.dot_dimension_numbers<[1], [0], [0], [1], [0, 0, 1, 1], [], []>} : vector<64x36xbf16>, vector<36x16xbf16>, vector<64x16xf32> -> vector<64x16xf32>
    %c0_4 = arith.constant 0 : index
    %c0_5 = arith.constant 0 : index
    %4 = vector.load %arg3[%c0_4, %c0_5] : memref<1x16xf32, #tpu.memory_space<vmem>>, vector<1x16xf32>
    %5 = vector.broadcast %4 : vector<1x16xf32> to vector<64x16xf32>
    %6 = arith.addf %3, %5 : vector<64x16xf32>
    %cst_6 = arith.constant 0.000000e+00 : f32
    %7 = vector.broadcast %cst_6 : f32 to vector<64x16xf32>
    %8 = arith.cmpf ogt, %6, %7 : vector<64x16xf32>
    %cst_7 = arith.constant 2.000000e-01 : f32
    %9 = vector.broadcast %cst_7 : f32 to vector<64x16xf32>
    %10 = arith.mulf %9, %6 : vector<64x16xf32>
    %11 = arith.select %8, %6, %10 : vector<64x16xi1>, vector<64x16xf32>
    %12 = arith.truncf %11 : vector<64x16xf32> to vector<64x16xbf16>
    %cst_8 = arith.constant 0.000000e+00 : bf16
    %13 = vector.broadcast %cst_8 : bf16 to vector<16x3x3x16xbf16>
    %c0_9 = arith.constant 0 : index
    %c0_10 = arith.constant 0 : index
    %c0_11 = arith.constant 0 : index
    %c0_12 = arith.constant 0 : index
    %14 = vector.load %arg7[%c0_9, %c0_10, %c0_11, %c0_12] : memref<16x3x3x16xbf16, #tpu.memory_space<vmem>>, vector<16x3x3x16xbf16>
    tpu.vector_store %arg7[%c0_9, %c0_10, %c0_11, %c0_12], %13 {strides = array<i32>} : memref<16x3x3x16xbf16, #tpu.memory_space<vmem>>, vector<16x3x3x16xbf16>,
    %15 = vector.extract_strided_slice %12 {offsets = [0, 0], sizes = [2, 16], strides = [1, 1]} : vector<64x16xbf16> to vector<2x16xbf16>
    %c0_13 = arith.constant 0 : index
    %c1 = arith.constant 1 : index
    %c1_14 = arith.constant 1 : index
    %c0_15 = arith.constant 0 : index
    %16 = vector.load %arg7[%c0_13, %c1, %c1_14, %c0_15] : memref<16x3x3x16xbf16, #tpu.memory_space<vmem>>, vector<1x1x2x16xbf16>
    %17 = vector.shape_cast %16 : vector<1x1x2x16xbf16> to vector<2x16xbf16>
    %18 = vector.shape_cast %15 : vector<2x16xbf16> to vector<1x1x2x16xbf16>
    tpu.vector_store %arg7[%c0_13, %c1, %c1_14, %c0_15], %18 {strides = array<i32>} : memref<16x3x3x16xbf16, #tpu.memory_space<vmem>>, vector<1x1x2x16xbf16>,
    %19 = vector.extract_strided_slice %12 {offsets = [2, 0], sizes = [2, 16], strides = [1, 1]} : vector<64x16xbf16> to vector<2x16xbf16>
    %c0_16 = arith.constant 0 : index
    %c2 = arith.constant 2 : index
    %c1_17 = arith.constant 1 : index
    %c0_18 = arith.constant 0 : index
    %20 = vector.load %arg7[%c0_16, %c2, %c1_17, %c0_18] : memref<16x3x3x16xbf16, #tpu.memory_space<vmem>>, vector<1x1x2x16xbf16>
    %21 = vector.shape_cast %20 : vector<1x1x2x16xbf16> to vector<2x16xbf16>
    %22 = vector.shape_cast %19 : vector<2x16xbf16> to vector<1x1x2x16xbf16>
    tpu.vector_store %arg7[%c0_16, %c2, %c1_17, %c0_18], %22 {strides = array<i32>} : memref<16x3x3x16xbf16, #tpu.memory_space<vmem>>, vector<1x1x2x16xbf16>,
    %23 = vector.extract_strided_slice %12 {offsets = [4, 0], sizes = [2, 16], strides = [1, 1]} : vector<64x16xbf16> to vector<2x16xbf16>
    %c1_19 = arith.constant 1 : index
    %c1_20 = arith.constant 1 : index
    %c0_21 = arith.constant 0 : index
    %c0_22 = arith.constant 0 : index
    %24 = vector.load %arg7[%c1_19, %c1_20, %c0_21, %c0_22] : memref<16x3x3x16xbf16, #tpu.memory_space<vmem>>, vector<1x1x2x16xbf16>
    %25 = vector.shape_cast %24 : vector<1x1x2x16xbf16> to vector<2x16xbf16>
    %26 = vector.shape_cast %23 : vector<2x16xbf16> to vector<1x1x2x16xbf16>
    tpu.vector_store %arg7[%c1_19, %c1_20, %c0_21, %c0_22], %26 {strides = array<i32>} : memref<16x3x3x16xbf16, #tpu.memory_space<vmem>>, vector<1x1x2x16xbf16>,
    %27 = vector.extract_strided_slice %12 {offsets = [6, 0], sizes = [2, 16], strides = [1, 1]} : vector<64x16xbf16> to vector<2x16xbf16>
    %c1_23 = arith.constant 1 : index
    %c2_24 = arith.constant 2 : index
    %c0_25 = arith.constant 0 : index
    %c0_26 = arith.constant 0 : index
    %28 = vector.load %arg7[%c1_23, %c2_24, %c0_25, %c0_26] : memref<16x3x3x16xbf16, #tpu.memory_space<vmem>>, vector<1x1x2x16xbf16>
    %29 = vector.shape_cast %28 : vector<1x1x2x16xbf16> to vector<2x16xbf16>
    %30 = vector.shape_cast %27 : vector<2x16xbf16> to vector<1x1x2x16xbf16>
    tpu.vector_store %arg7[%c1_23, %c2_24, %c0_25, %c0_26], %30 {strides = array<i32>} : memref<16x3x3x16xbf16, #tpu.memory_space<vmem>>, vector<1x1x2x16xbf16>,
    %31 = vector.extract_strided_slice %12 {offsets = [8, 0], sizes = [2, 16], strides = [1, 1]} : vector<64x16xbf16> to vector<2x16xbf16>
    %c2_27 = arith.constant 2 : index
    %c1_28 = arith.constant 1 : index
    %c0_29 = arith.constant 0 : index
    %c0_30 = arith.constant 0 : index
    %32 = vector.load %arg7[%c2_27, %c1_28, %c0_29, %c0_30] : memref<16x3x3x16xbf16, #tpu.memory_space<vmem>>, vector<1x1x2x16xbf16>
    %33 = vector.shape_cast %32 : vector<1x1x2x16xbf16> to vector<2x16xbf16>
    %34 = vector.shape_cast %31 : vector<2x16xbf16> to vector<1x1x2x16xbf16>
    tpu.vector_store %arg7[%c2_27, %c1_28, %c0_29, %c0_30], %34 {strides = array<i32>} : memref<16x3x3x16xbf16, #tpu.memory_space<vmem>>, vector<1x1x2x16xbf16>,
    %35 = vector.extract_strided_slice %12 {offsets = [10, 0], sizes = [2, 16], strides = [1, 1]} : vector<64x16xbf16> to vector<2x16xbf16>
    %c2_31 = arith.constant 2 : index
    %c2_32 = arith.constant 2 : index
    %c0_33 = arith.constant 0 : index
    %c0_34 = arith.constant 0 : index
    %36 = vector.load %arg7[%c2_31, %c2_32, %c0_33, %c0_34] : memref<16x3x3x16xbf16, #tpu.memory_space<vmem>>, vector<1x1x2x16xbf16>
    %37 = vector.shape_cast %36 : vector<1x1x2x16xbf16> to vector<2x16xbf16>
    %38 = vector.shape_cast %35 : vector<2x16xbf16> to vector<1x1x2x16xbf16>
    tpu.vector_store %arg7[%c2_31, %c2_32, %c0_33, %c0_34], %38 {strides = array<i32>} : memref<16x3x3x16xbf16, #tpu.memory_space<vmem>>, vector<1x1x2x16xbf16>,
    %39 = vector.extract_strided_slice %12 {offsets = [12, 0], sizes = [2, 16], strides = [1, 1]} : vector<64x16xbf16> to vector<2x16xbf16>
    %c3 = arith.constant 3 : index
    %c1_35 = arith.constant 1 : index
    %c0_36 = arith.constant 0 : index
    %c0_37 = arith.constant 0 : index
    %40 = vector.load %arg7[%c3, %c1_35, %c0_36, %c0_37] : memref<16x3x3x16xbf16, #tpu.memory_space<vmem>>, vector<1x1x2x16xbf16>
    %41 = vector.shape_cast %40 : vector<1x1x2x16xbf16> to vector<2x16xbf16>
    %42 = vector.shape_cast %39 : vector<2x16xbf16> to vector<1x1x2x16xbf16>
    tpu.vector_store %arg7[%c3, %c1_35, %c0_36, %c0_37], %42 {strides = array<i32>} : memref<16x3x3x16xbf16, #tpu.memory_space<vmem>>, vector<1x1x2x16xbf16>,
    %43 = vector.extract_strided_slice %12 {offsets = [14, 0], sizes = [2, 16], strides = [1, 1]} : vector<64x16xbf16> to vector<2x16xbf16>
    %c3_38 = arith.constant 3 : index
    %c2_39 = arith.constant 2 : index
    %c0_40 = arith.constant 0 : index
    %c0_41 = arith.constant 0 : index
    %44 = vector.load %arg7[%c3_38, %c2_39, %c0_40, %c0_41] : memref<16x3x3x16xbf16, #tpu.memory_space<vmem>>, vector<1x1x2x16xbf16>
    %45 = vector.shape_cast %44 : vector<1x1x2x16xbf16> to vector<2x16xbf16>
    %46 = vector.shape_cast %43 : vector<2x16xbf16> to vector<1x1x2x16xbf16>
    tpu.vector_store %arg7[%c3_38, %c2_39, %c0_40, %c0_41], %46 {strides = array<i32>} : memref<16x3x3x16xbf16, #tpu.memory_space<vmem>>, vector<1x1x2x16xbf16>,
    %47 = vector.extract_strided_slice %12 {offsets = [16, 0], sizes = [2, 16], strides = [1, 1]} : vector<64x16xbf16> to vector<2x16xbf16>
    %c4 = arith.constant 4 : index
    %c0_42 = arith.constant 0 : index
    %c1_43 = arith.constant 1 : index
    %c0_44 = arith.constant 0 : index
    %48 = vector.load %arg7[%c4, %c0_42, %c1_43, %c0_44] : memref<16x3x3x16xbf16, #tpu.memory_space<vmem>>, vector<1x1x2x16xbf16>
    %49 = vector.shape_cast %48 : vector<1x1x2x16xbf16> to vector<2x16xbf16>
    %50 = vector.shape_cast %47 : vector<2x16xbf16> to vector<1x1x2x16xbf16>
    tpu.vector_store %arg7[%c4, %c0_42, %c1_43, %c0_44], %50 {strides = array<i32>} : memref<16x3x3x16xbf16, #tpu.memory_space<vmem>>, vector<1x1x2x16xbf16>,
    %51 = vector.extract_strided_slice %12 {offsets = [18, 0], sizes = [2, 16], strides = [1, 1]} : vector<64x16xbf16> to vector<2x16xbf16>
    %c4_45 = arith.constant 4 : index
    %c1_46 = arith.constant 1 : index
    %c1_47 = arith.constant 1 : index
    %c0_48 = arith.constant 0 : index
    %52 = vector.load %arg7[%c4_45, %c1_46, %c1_47, %c0_48] : memref<16x3x3x16xbf16, #tpu.memory_space<vmem>>, vector<1x1x2x16xbf16>
    %53 = vector.shape_cast %52 : vector<1x1x2x16xbf16> to vector<2x16xbf16>
    %54 = vector.shape_cast %51 : vector<2x16xbf16> to vector<1x1x2x16xbf16>
    tpu.vector_store %arg7[%c4_45, %c1_46, %c1_47, %c0_48], %54 {strides = array<i32>} : memref<16x3x3x16xbf16, #tpu.memory_space<vmem>>, vector<1x1x2x16xbf16>,
    %55 = vector.extract_strided_slice %12 {offsets = [20, 0], sizes = [2, 16], strides = [1, 1]} : vector<64x16xbf16> to vector<2x16xbf16>
    %c5 = arith.constant 5 : index
    %c0_49 = arith.constant 0 : index
    %c0_50 = arith.constant 0 : index
    %c0_51 = arith.constant 0 : index
    %56 = vector.load %arg7[%c5, %c0_49, %c0_50, %c0_51] : memref<16x3x3x16xbf16, #tpu.memory_space<vmem>>, vector<1x1x2x16xbf16>
    %57 = vector.shape_cast %56 : vector<1x1x2x16xbf16> to vector<2x16xbf16>
    %58 = vector.shape_cast %55 : vector<2x16xbf16> to vector<1x1x2x16xbf16>
    tpu.vector_store %arg7[%c5, %c0_49, %c0_50, %c0_51], %58 {strides = array<i32>} : memref<16x3x3x16xbf16, #tpu.memory_space<vmem>>, vector<1x1x2x16xbf16>,
    %59 = vector.extract_strided_slice %12 {offsets = [22, 0], sizes = [2, 16], strides = [1, 1]} : vector<64x16xbf16> to vector<2x16xbf16>
    %c5_52 = arith.constant 5 : index
    %c1_53 = arith.constant 1 : index
    %c0_54 = arith.constant 0 : index
    %c0_55 = arith.constant 0 : index
    %60 = vector.load %arg7[%c5_52, %c1_53, %c0_54, %c0_55] : memref<16x3x3x16xbf16, #tpu.memory_space<vmem>>, vector<1x1x2x16xbf16>
    %61 = vector.shape_cast %60 : vector<1x1x2x16xbf16> to vector<2x16xbf16>
    %62 = vector.shape_cast %59 : vector<2x16xbf16> to vector<1x1x2x16xbf16>
    tpu.vector_store %arg7[%c5_52, %c1_53, %c0_54, %c0_55], %62 {strides = array<i32>} : memref<16x3x3x16xbf16, #tpu.memory_space<vmem>>, vector<1x1x2x16xbf16>,
    %63 = vector.extract_strided_slice %12 {offsets = [24, 0], sizes = [2, 16], strides = [1, 1]} : vector<64x16xbf16> to vector<2x16xbf16>
    %c6 = arith.constant 6 : index
    %c0_56 = arith.constant 0 : index
    %c0_57 = arith.constant 0 : index
    %c0_58 = arith.constant 0 : index
    %64 = vector.load %arg7[%c6, %c0_56, %c0_57, %c0_58] : memref<16x3x3x16xbf16, #tpu.memory_space<vmem>>, vector<1x1x2x16xbf16>
    %65 = vector.shape_cast %64 : vector<1x1x2x16xbf16> to vector<2x16xbf16>
    %66 = vector.shape_cast %63 : vector<2x16xbf16> to vector<1x1x2x16xbf16>
    tpu.vector_store %arg7[%c6, %c0_56, %c0_57, %c0_58], %66 {strides = array<i32>} : memref<16x3x3x16xbf16, #tpu.memory_space<vmem>>, vector<1x1x2x16xbf16>,
    %67 = vector.extract_strided_slice %12 {offsets = [26, 0], sizes = [2, 16], strides = [1, 1]} : vector<64x16xbf16> to vector<2x16xbf16>
    %c6_59 = arith.constant 6 : index
    %c1_60 = arith.constant 1 : index
    %c0_61 = arith.constant 0 : index
    %c0_62 = arith.constant 0 : index
    %68 = vector.load %arg7[%c6_59, %c1_60, %c0_61, %c0_62] : memref<16x3x3x16xbf16, #tpu.memory_space<vmem>>, vector<1x1x2x16xbf16>
    %69 = vector.shape_cast %68 : vector<1x1x2x16xbf16> to vector<2x16xbf16>
    %70 = vector.shape_cast %67 : vector<2x16xbf16> to vector<1x1x2x16xbf16>
    tpu.vector_store %arg7[%c6_59, %c1_60, %c0_61, %c0_62], %70 {strides = array<i32>} : memref<16x3x3x16xbf16, #tpu.memory_space<vmem>>, vector<1x1x2x16xbf16>,
    %71 = vector.extract_strided_slice %12 {offsets = [28, 0], sizes = [2, 16], strides = [1, 1]} : vector<64x16xbf16> to vector<2x16xbf16>
    %c7 = arith.constant 7 : index
    %c0_63 = arith.constant 0 : index
    %c0_64 = arith.constant 0 : index
    %c0_65 = arith.constant 0 : index
    %72 = vector.load %arg7[%c7, %c0_63, %c0_64, %c0_65] : memref<16x3x3x16xbf16, #tpu.memory_space<vmem>>, vector<1x1x2x16xbf16>
    %73 = vector.shape_cast %72 : vector<1x1x2x16xbf16> to vector<2x16xbf16>
    %74 = vector.shape_cast %71 : vector<2x16xbf16> to vector<1x1x2x16xbf16>
    tpu.vector_store %arg7[%c7, %c0_63, %c0_64, %c0_65], %74 {strides = array<i32>} : memref<16x3x3x16xbf16, #tpu.memory_space<vmem>>, vector<1x1x2x16xbf16>,
    %75 = vector.extract_strided_slice %12 {offsets = [30, 0], sizes = [2, 16], strides = [1, 1]} : vector<64x16xbf16> to vector<2x16xbf16>
    %c7_66 = arith.constant 7 : index
    %c1_67 = arith.constant 1 : index
    %c0_68 = arith.constant 0 : index
    %c0_69 = arith.constant 0 : index
    %76 = vector.load %arg7[%c7_66, %c1_67, %c0_68, %c0_69] : memref<16x3x3x16xbf16, #tpu.memory_space<vmem>>, vector<1x1x2x16xbf16>
    %77 = vector.shape_cast %76 : vector<1x1x2x16xbf16> to vector<2x16xbf16>
    %78 = vector.shape_cast %75 : vector<2x16xbf16> to vector<1x1x2x16xbf16>
    tpu.vector_store %arg7[%c7_66, %c1_67, %c0_68, %c0_69], %78 {strides = array<i32>} : memref<16x3x3x16xbf16, #tpu.memory_space<vmem>>, vector<1x1x2x16xbf16>,
    %79 = vector.extract_strided_slice %12 {offsets = [32, 0], sizes = [2, 16], strides = [1, 1]} : vector<64x16xbf16> to vector<2x16xbf16>
    %c8 = arith.constant 8 : index
    %c0_70 = arith.constant 0 : index
    %c1_71 = arith.constant 1 : index
    %c0_72 = arith.constant 0 : index
    %80 = vector.load %arg7[%c8, %c0_70, %c1_71, %c0_72] : memref<16x3x3x16xbf16, #tpu.memory_space<vmem>>, vector<1x1x2x16xbf16>
    %81 = vector.shape_cast %80 : vector<1x1x2x16xbf16> to vector<2x16xbf16>
    %82 = vector.shape_cast %79 : vector<2x16xbf16> to vector<1x1x2x16xbf16>
    tpu.vector_store %arg7[%c8, %c0_70, %c1_71, %c0_72], %82 {strides = array<i32>} : memref<16x3x3x16xbf16, #tpu.memory_space<vmem>>, vector<1x1x2x16xbf16>,
    %83 = vector.extract_strided_slice %12 {offsets = [34, 0], sizes = [2, 16], strides = [1, 1]} : vector<64x16xbf16> to vector<2x16xbf16>
    %c8_73 = arith.constant 8 : index
    %c1_74 = arith.constant 1 : index
    %c1_75 = arith.constant 1 : index
    %c0_76 = arith.constant 0 : index
    %84 = vector.load %arg7[%c8_73, %c1_74, %c1_75, %c0_76] : memref<16x3x3x16xbf16, #tpu.memory_space<vmem>>, vector<1x1x2x16xbf16>
    %85 = vector.shape_cast %84 : vector<1x1x2x16xbf16> to vector<2x16xbf16>
    %86 = vector.shape_cast %83 : vector<2x16xbf16> to vector<1x1x2x16xbf16>
    tpu.vector_store %arg7[%c8_73, %c1_74, %c1_75, %c0_76], %86 {strides = array<i32>} : memref<16x3x3x16xbf16, #tpu.memory_space<vmem>>, vector<1x1x2x16xbf16>,
    %87 = vector.extract_strided_slice %12 {offsets = [36, 0], sizes = [2, 16], strides = [1, 1]} : vector<64x16xbf16> to vector<2x16xbf16>
    %c9 = arith.constant 9 : index
    %c0_77 = arith.constant 0 : index
    %c0_78 = arith.constant 0 : index
    %c0_79 = arith.constant 0 : index
    %88 = vector.load %arg7[%c9, %c0_77, %c0_78, %c0_79] : memref<16x3x3x16xbf16, #tpu.memory_space<vmem>>, vector<1x1x2x16xbf16>
    %89 = vector.shape_cast %88 : vector<1x1x2x16xbf16> to vector<2x16xbf16>
    %90 = vector.shape_cast %87 : vector<2x16xbf16> to vector<1x1x2x16xbf16>
    tpu.vector_store %arg7[%c9, %c0_77, %c0_78, %c0_79], %90 {strides = array<i32>} : memref<16x3x3x16xbf16, #tpu.memory_space<vmem>>, vector<1x1x2x16xbf16>,
    %91 = vector.extract_strided_slice %12 {offsets = [38, 0], sizes = [2, 16], strides = [1, 1]} : vector<64x16xbf16> to vector<2x16xbf16>
    %c9_80 = arith.constant 9 : index
    %c1_81 = arith.constant 1 : index
    %c0_82 = arith.constant 0 : index
    %c0_83 = arith.constant 0 : index
    %92 = vector.load %arg7[%c9_80, %c1_81, %c0_82, %c0_83] : memref<16x3x3x16xbf16, #tpu.memory_space<vmem>>, vector<1x1x2x16xbf16>
    %93 = vector.shape_cast %92 : vector<1x1x2x16xbf16> to vector<2x16xbf16>
    %94 = vector.shape_cast %91 : vector<2x16xbf16> to vector<1x1x2x16xbf16>
    tpu.vector_store %arg7[%c9_80, %c1_81, %c0_82, %c0_83], %94 {strides = array<i32>} : memref<16x3x3x16xbf16, #tpu.memory_space<vmem>>, vector<1x1x2x16xbf16>,
    %95 = vector.extract_strided_slice %12 {offsets = [40, 0], sizes = [2, 16], strides = [1, 1]} : vector<64x16xbf16> to vector<2x16xbf16>
    %c10 = arith.constant 10 : index
    %c0_84 = arith.constant 0 : index
    %c0_85 = arith.constant 0 : index
    %c0_86 = arith.constant 0 : index
    %96 = vector.load %arg7[%c10, %c0_84, %c0_85, %c0_86] : memref<16x3x3x16xbf16, #tpu.memory_space<vmem>>, vector<1x1x2x16xbf16>
    %97 = vector.shape_cast %96 : vector<1x1x2x16xbf16> to vector<2x16xbf16>
    %98 = vector.shape_cast %95 : vector<2x16xbf16> to vector<1x1x2x16xbf16>
    tpu.vector_store %arg7[%c10, %c0_84, %c0_85, %c0_86], %98 {strides = array<i32>} : memref<16x3x3x16xbf16, #tpu.memory_space<vmem>>, vector<1x1x2x16xbf16>,
    %99 = vector.extract_strided_slice %12 {offsets = [42, 0], sizes = [2, 16], strides = [1, 1]} : vector<64x16xbf16> to vector<2x16xbf16>
    %c10_87 = arith.constant 10 : index
    %c1_88 = arith.constant 1 : index
    %c0_89 = arith.constant 0 : index
    %c0_90 = arith.constant 0 : index
    %100 = vector.load %arg7[%c10_87, %c1_88, %c0_89, %c0_90] : memref<16x3x3x16xbf16, #tpu.memory_space<vmem>>, vector<1x1x2x16xbf16>
    %101 = vector.shape_cast %100 : vector<1x1x2x16xbf16> to vector<2x16xbf16>
    %102 = vector.shape_cast %99 : vector<2x16xbf16> to vector<1x1x2x16xbf16>
    tpu.vector_store %arg7[%c10_87, %c1_88, %c0_89, %c0_90], %102 {strides = array<i32>} : memref<16x3x3x16xbf16, #tpu.memory_space<vmem>>, vector<1x1x2x16xbf16>,
    %103 = vector.extract_strided_slice %12 {offsets = [44, 0], sizes = [2, 16], strides = [1, 1]} : vector<64x16xbf16> to vector<2x16xbf16>
    %c11 = arith.constant 11 : index
    %c0_91 = arith.constant 0 : index
    %c0_92 = arith.constant 0 : index
    %c0_93 = arith.constant 0 : index
    %104 = vector.load %arg7[%c11, %c0_91, %c0_92, %c0_93] : memref<16x3x3x16xbf16, #tpu.memory_space<vmem>>, vector<1x1x2x16xbf16>
    %105 = vector.shape_cast %104 : vector<1x1x2x16xbf16> to vector<2x16xbf16>
    %106 = vector.shape_cast %103 : vector<2x16xbf16> to vector<1x1x2x16xbf16>
    tpu.vector_store %arg7[%c11, %c0_91, %c0_92, %c0_93], %106 {strides = array<i32>} : memref<16x3x3x16xbf16, #tpu.memory_space<vmem>>, vector<1x1x2x16xbf16>,
    %107 = vector.extract_strided_slice %12 {offsets = [46, 0], sizes = [2, 16], strides = [1, 1]} : vector<64x16xbf16> to vector<2x16xbf16>
    %c11_94 = arith.constant 11 : index
    %c1_95 = arith.constant 1 : index
    %c0_96 = arith.constant 0 : index
    %c0_97 = arith.constant 0 : index
    %108 = vector.load %arg7[%c11_94, %c1_95, %c0_96, %c0_97] : memref<16x3x3x16xbf16, #tpu.memory_space<vmem>>, vector<1x1x2x16xbf16>
    %109 = vector.shape_cast %108 : vector<1x1x2x16xbf16> to vector<2x16xbf16>
    %110 = vector.shape_cast %107 : vector<2x16xbf16> to vector<1x1x2x16xbf16>
    tpu.vector_store %arg7[%c11_94, %c1_95, %c0_96, %c0_97], %110 {strides = array<i32>} : memref<16x3x3x16xbf16, #tpu.memory_space<vmem>>, vector<1x1x2x16xbf16>,
    %111 = vector.extract_strided_slice %12 {offsets = [48, 0], sizes = [2, 16], strides = [1, 1]} : vector<64x16xbf16> to vector<2x16xbf16>
    %c12 = arith.constant 12 : index
    %c0_98 = arith.constant 0 : index
    %c1_99 = arith.constant 1 : index
    %c0_100 = arith.constant 0 : index
    %112 = vector.load %arg7[%c12, %c0_98, %c1_99, %c0_100] : memref<16x3x3x16xbf16, #tpu.memory_space<vmem>>, vector<1x1x2x16xbf16>
    %113 = vector.shape_cast %112 : vector<1x1x2x16xbf16> to vector<2x16xbf16>
    %114 = vector.shape_cast %111 : vector<2x16xbf16> to vector<1x1x2x16xbf16>
    tpu.vector_store %arg7[%c12, %c0_98, %c1_99, %c0_100], %114 {strides = array<i32>} : memref<16x3x3x16xbf16, #tpu.memory_space<vmem>>, vector<1x1x2x16xbf16>,
    %115 = vector.extract_strided_slice %12 {offsets = [50, 0], sizes = [2, 16], strides = [1, 1]} : vector<64x16xbf16> to vector<2x16xbf16>
    %c12_101 = arith.constant 12 : index
    %c1_102 = arith.constant 1 : index
    %c1_103 = arith.constant 1 : index
    %c0_104 = arith.constant 0 : index
    %116 = vector.load %arg7[%c12_101, %c1_102, %c1_103, %c0_104] : memref<16x3x3x16xbf16, #tpu.memory_space<vmem>>, vector<1x1x2x16xbf16>
    %117 = vector.shape_cast %116 : vector<1x1x2x16xbf16> to vector<2x16xbf16>
    %118 = vector.shape_cast %115 : vector<2x16xbf16> to vector<1x1x2x16xbf16>
    tpu.vector_store %arg7[%c12_101, %c1_102, %c1_103, %c0_104], %118 {strides = array<i32>} : memref<16x3x3x16xbf16, #tpu.memory_space<vmem>>, vector<1x1x2x16xbf16>,
    %119 = vector.extract_strided_slice %12 {offsets = [52, 0], sizes = [2, 16], strides = [1, 1]} : vector<64x16xbf16> to vector<2x16xbf16>
    %c13 = arith.constant 13 : index
    %c0_105 = arith.constant 0 : index
    %c0_106 = arith.constant 0 : index
    %c0_107 = arith.constant 0 : index
    %120 = vector.load %arg7[%c13, %c0_105, %c0_106, %c0_107] : memref<16x3x3x16xbf16, #tpu.memory_space<vmem>>, vector<1x1x2x16xbf16>
    %121 = vector.shape_cast %120 : vector<1x1x2x16xbf16> to vector<2x16xbf16>
    %122 = vector.shape_cast %119 : vector<2x16xbf16> to vector<1x1x2x16xbf16>
    tpu.vector_store %arg7[%c13, %c0_105, %c0_106, %c0_107], %122 {strides = array<i32>} : memref<16x3x3x16xbf16, #tpu.memory_space<vmem>>, vector<1x1x2x16xbf16>,
    %123 = vector.extract_strided_slice %12 {offsets = [54, 0], sizes = [2, 16], strides = [1, 1]} : vector<64x16xbf16> to vector<2x16xbf16>
    %c13_108 = arith.constant 13 : index
    %c1_109 = arith.constant 1 : index
    %c0_110 = arith.constant 0 : index
    %c0_111 = arith.constant 0 : index
    %124 = vector.load %arg7[%c13_108, %c1_109, %c0_110, %c0_111] : memref<16x3x3x16xbf16, #tpu.memory_space<vmem>>, vector<1x1x2x16xbf16>
    %125 = vector.shape_cast %124 : vector<1x1x2x16xbf16> to vector<2x16xbf16>
    %126 = vector.shape_cast %123 : vector<2x16xbf16> to vector<1x1x2x16xbf16>
    tpu.vector_store %arg7[%c13_108, %c1_109, %c0_110, %c0_111], %126 {strides = array<i32>} : memref<16x3x3x16xbf16, #tpu.memory_space<vmem>>, vector<1x1x2x16xbf16>,
    %127 = vector.extract_strided_slice %12 {offsets = [56, 0], sizes = [2, 16], strides = [1, 1]} : vector<64x16xbf16> to vector<2x16xbf16>
    %c14 = arith.constant 14 : index
    %c0_112 = arith.constant 0 : index
    %c0_113 = arith.constant 0 : index
    %c0_114 = arith.constant 0 : index
    %128 = vector.load %arg7[%c14, %c0_112, %c0_113, %c0_114] : memref<16x3x3x16xbf16, #tpu.memory_space<vmem>>, vector<1x1x2x16xbf16>
    %129 = vector.shape_cast %128 : vector<1x1x2x16xbf16> to vector<2x16xbf16>
    %130 = vector.shape_cast %127 : vector<2x16xbf16> to vector<1x1x2x16xbf16>
    tpu.vector_store %arg7[%c14, %c0_112, %c0_113, %c0_114], %130 {strides = array<i32>} : memref<16x3x3x16xbf16, #tpu.memory_space<vmem>>, vector<1x1x2x16xbf16>,
    %131 = vector.extract_strided_slice %12 {offsets = [58, 0], sizes = [2, 16], strides = [1, 1]} : vector<64x16xbf16> to vector<2x16xbf16>
    %c14_115 = arith.constant 14 : index
    %c1_116 = arith.constant 1 : index
    %c0_117 = arith.constant 0 : index
    %c0_118 = arith.constant 0 : index
    %132 = vector.load %arg7[%c14_115, %c1_116, %c0_117, %c0_118] : memref<16x3x3x16xbf16, #tpu.memory_space<vmem>>, vector<1x1x2x16xbf16>
    %133 = vector.shape_cast %132 : vector<1x1x2x16xbf16> to vector<2x16xbf16>
    %134 = vector.shape_cast %131 : vector<2x16xbf16> to vector<1x1x2x16xbf16>
    tpu.vector_store %arg7[%c14_115, %c1_116, %c0_117, %c0_118], %134 {strides = array<i32>} : memref<16x3x3x16xbf16, #tpu.memory_space<vmem>>, vector<1x1x2x16xbf16>,
    %135 = vector.extract_strided_slice %12 {offsets = [60, 0], sizes = [2, 16], strides = [1, 1]} : vector<64x16xbf16> to vector<2x16xbf16>
    %c15 = arith.constant 15 : index
    %c0_119 = arith.constant 0 : index
    %c0_120 = arith.constant 0 : index
    %c0_121 = arith.constant 0 : index
    %136 = vector.load %arg7[%c15, %c0_119, %c0_120, %c0_121] : memref<16x3x3x16xbf16, #tpu.memory_space<vmem>>, vector<1x1x2x16xbf16>
    %137 = vector.shape_cast %136 : vector<1x1x2x16xbf16> to vector<2x16xbf16>
    %138 = vector.shape_cast %135 : vector<2x16xbf16> to vector<1x1x2x16xbf16>
    tpu.vector_store %arg7[%c15, %c0_119, %c0_120, %c0_121], %138 {strides = array<i32>} : memref<16x3x3x16xbf16, #tpu.memory_space<vmem>>, vector<1x1x2x16xbf16>,
    %139 = vector.extract_strided_slice %12 {offsets = [62, 0], sizes = [2, 16], strides = [1, 1]} : vector<64x16xbf16> to vector<2x16xbf16>
    %c15_122 = arith.constant 15 : index
    %c1_123 = arith.constant 1 : index
    %c0_124 = arith.constant 0 : index
    %c0_125 = arith.constant 0 : index
    %140 = vector.load %arg7[%c15_122, %c1_123, %c0_124, %c0_125] : memref<16x3x3x16xbf16, #tpu.memory_space<vmem>>, vector<1x1x2x16xbf16>
    %141 = vector.shape_cast %140 : vector<1x1x2x16xbf16> to vector<2x16xbf16>
    %142 = vector.shape_cast %139 : vector<2x16xbf16> to vector<1x1x2x16xbf16>
    tpu.vector_store %arg7[%c15_122, %c1_123, %c0_124, %c0_125], %142 {strides = array<i32>} : memref<16x3x3x16xbf16, #tpu.memory_space<vmem>>, vector<1x1x2x16xbf16>,
    %c0_126 = arith.constant 0 : index
    %c0_127 = arith.constant 0 : index
    %143 = vector.load %arg5[%c0_126, %c0_127] : memref<1x16xf32, #tpu.memory_space<vmem>>, vector<1x16xf32>
    %cst_128 = arith.constant 0.000000e+00 : f32
    %144 = vector.broadcast %cst_128 : f32 to vector<4x16xf32>
    %c0_129 = arith.constant 0 : index
    %c0_130 = arith.constant 0 : index
    %c0_131 = arith.constant 0 : index
    %c0_132 = arith.constant 0 : index
    %145 = vector.load %arg7[%c0_129, %c0_130, %c0_131, %c0_132] : memref<16x3x3x16xbf16, #tpu.memory_space<vmem>>, vector<1x2x2x16xbf16>
    %146 = vector.shape_cast %145 : vector<1x2x2x16xbf16> to vector<2x2x16xbf16>
    %147 = vector.shape_cast %146 : vector<2x2x16xbf16> to vector<4x16xbf16>
    %c0_133 = arith.constant 0 : index
    %c0_134 = arith.constant 0 : index
    %c0_135 = arith.constant 0 : index
    %148 = vector.load %arg4[%c0_133, %c0_134, %c0_135] : memref<9x16x16xbf16, #tpu.memory_space<vmem>>, vector<1x16x16xbf16>
    %149 = vector.shape_cast %148 : vector<1x16x16xbf16> to vector<16x16xbf16>
    %cst_136 = arith.constant dense<0.000000e+00> : vector<4x16xf32>
    %150 = tpu.matmul %147, %149, %cst_136 {dimension_numbers = #tpu.dot_dimension_numbers<[1], [0], [0], [1], [0, 0, 1, 1], [], []>} : vector<4x16xbf16>, vector<16x16xbf16>, vector<4x16xf32> -> vector<4x16xf32>
    %151 = arith.addf %144, %150 : vector<4x16xf32>
    %c1_137 = arith.constant 1 : index
    %c0_138 = arith.constant 0 : index
    %c0_139 = arith.constant 0 : index
    %c0_140 = arith.constant 0 : index
    %152 = vector.load %arg7[%c1_137, %c0_138, %c0_139, %c0_140] : memref<16x3x3x16xbf16, #tpu.memory_space<vmem>>, vector<1x2x2x16xbf16>
    %153 = vector.shape_cast %152 : vector<1x2x2x16xbf16> to vector<2x2x16xbf16>
    %154 = vector.shape_cast %153 : vector<2x2x16xbf16> to vector<4x16xbf16>
    %c1_141 = arith.constant 1 : index
    %c0_142 = arith.constant 0 : index
    %c0_143 = arith.constant 0 : index
    %155 = vector.load %arg4[%c1_141, %c0_142, %c0_143] : memref<9x16x16xbf16, #tpu.memory_space<vmem>>, vector<1x16x16xbf16>
    %156 = vector.shape_cast %155 : vector<1x16x16xbf16> to vector<16x16xbf16>
    %cst_144 = arith.constant dense<0.000000e+00> : vector<4x16xf32>
    %157 = tpu.matmul %154, %156, %cst_144 {dimension_numbers = #tpu.dot_dimension_numbers<[1], [0], [0], [1], [0, 0, 1, 1], [], []>} : vector<4x16xbf16>, vector<16x16xbf16>, vector<4x16xf32> -> vector<4x16xf32>
    %158 = arith.addf %151, %157 : vector<4x16xf32>
    %c2_145 = arith.constant 2 : index
    %c0_146 = arith.constant 0 : index
    %c0_147 = arith.constant 0 : index
    %c0_148 = arith.constant 0 : index
    %159 = vector.load %arg7[%c2_145, %c0_146, %c0_147, %c0_148] : memref<16x3x3x16xbf16, #tpu.memory_space<vmem>>, vector<1x2x2x16xbf16>
    %160 = vector.shape_cast %159 : vector<1x2x2x16xbf16> to vector<2x2x16xbf16>
    %161 = vector.shape_cast %160 : vector<2x2x16xbf16> to vector<4x16xbf16>
    %c2_149 = arith.constant 2 : index
    %c0_150 = arith.constant 0 : index
    %c0_151 = arith.constant 0 : index
    %162 = vector.load %arg4[%c2_149, %c0_150, %c0_151] : memref<9x16x16xbf16, #tpu.memory_space<vmem>>, vector<1x16x16xbf16>
    %163 = vector.shape_cast %162 : vector<1x16x16xbf16> to vector<16x16xbf16>
    %cst_152 = arith.constant dense<0.000000e+00> : vector<4x16xf32>
    %164 = tpu.matmul %161, %163, %cst_152 {dimension_numbers = #tpu.dot_dimension_numbers<[1], [0], [0], [1], [0, 0, 1, 1], [], []>} : vector<4x16xbf16>, vector<16x16xbf16>, vector<4x16xf32> -> vector<4x16xf32>
    %165 = arith.addf %158, %164 : vector<4x16xf32>
    %c4_153 = arith.constant 4 : index
    %c0_154 = arith.constant 0 : index
    %c0_155 = arith.constant 0 : index
    %c0_156 = arith.constant 0 : index
    %166 = vector.load %arg7[%c4_153, %c0_154, %c0_155, %c0_156] : memref<16x3x3x16xbf16, #tpu.memory_space<vmem>>, vector<1x2x2x16xbf16>
    %167 = vector.shape_cast %166 : vector<1x2x2x16xbf16> to vector<2x2x16xbf16>
    %168 = vector.shape_cast %167 : vector<2x2x16xbf16> to vector<4x16xbf16>
    %c3_157 = arith.constant 3 : index
    %c0_158 = arith.constant 0 : index
    %c0_159 = arith.constant 0 : index
    %169 = vector.load %arg4[%c3_157, %c0_158, %c0_159] : memref<9x16x16xbf16, #tpu.memory_space<vmem>>, vector<1x16x16xbf16>
    %170 = vector.shape_cast %169 : vector<1x16x16xbf16> to vector<16x16xbf16>
    %cst_160 = arith.constant dense<0.000000e+00> : vector<4x16xf32>
    %171 = tpu.matmul %168, %170, %cst_160 {dimension_numbers = #tpu.dot_dimension_numbers<[1], [0], [0], [1], [0, 0, 1, 1], [], []>} : vector<4x16xbf16>, vector<16x16xbf16>, vector<4x16xf32> -> vector<4x16xf32>
    %172 = arith.addf %165, %171 : vector<4x16xf32>
    %c5_161 = arith.constant 5 : index
    %c0_162 = arith.constant 0 : index
    %c0_163 = arith.constant 0 : index
    %c0_164 = arith.constant 0 : index
    %173 = vector.load %arg7[%c5_161, %c0_162, %c0_163, %c0_164] : memref<16x3x3x16xbf16, #tpu.memory_space<vmem>>, vector<1x2x2x16xbf16>
    %174 = vector.shape_cast %173 : vector<1x2x2x16xbf16> to vector<2x2x16xbf16>
    %175 = vector.shape_cast %174 : vector<2x2x16xbf16> to vector<4x16xbf16>
    %c4_165 = arith.constant 4 : index
    %c0_166 = arith.constant 0 : index
    %c0_167 = arith.constant 0 : index
    %176 = vector.load %arg4[%c4_165, %c0_166, %c0_167] : memref<9x16x16xbf16, #tpu.memory_space<vmem>>, vector<1x16x16xbf16>
    %177 = vector.shape_cast %176 : vector<1x16x16xbf16> to vector<16x16xbf16>
    %cst_168 = arith.constant dense<0.000000e+00> : vector<4x16xf32>
    %178 = tpu.matmul %175, %177, %cst_168 {dimension_numbers = #tpu.dot_dimension_numbers<[1], [0], [0], [1], [0, 0, 1, 1], [], []>} : vector<4x16xbf16>, vector<16x16xbf16>, vector<4x16xf32> -> vector<4x16xf32>
    %179 = arith.addf %172, %178 : vector<4x16xf32>
    %c6_169 = arith.constant 6 : index
    %c0_170 = arith.constant 0 : index
    %c0_171 = arith.constant 0 : index
    %c0_172 = arith.constant 0 : index
    %180 = vector.load %arg7[%c6_169, %c0_170, %c0_171, %c0_172] : memref<16x3x3x16xbf16, #tpu.memory_space<vmem>>, vector<1x2x2x16xbf16>
    %181 = vector.shape_cast %180 : vector<1x2x2x16xbf16> to vector<2x2x16xbf16>
    %182 = vector.shape_cast %181 : vector<2x2x16xbf16> to vector<4x16xbf16>
    %c5_173 = arith.constant 5 : index
    %c0_174 = arith.constant 0 : index
    %c0_175 = arith.constant 0 : index
    %183 = vector.load %arg4[%c5_173, %c0_174, %c0_175] : memref<9x16x16xbf16, #tpu.memory_space<vmem>>, vector<1x16x16xbf16>
    %184 = vector.shape_cast %183 : vector<1x16x16xbf16> to vector<16x16xbf16>
    %cst_176 = arith.constant dense<0.000000e+00> : vector<4x16xf32>
    %185 = tpu.matmul %182, %184, %cst_176 {dimension_numbers = #tpu.dot_dimension_numbers<[1], [0], [0], [1], [0, 0, 1, 1], [], []>} : vector<4x16xbf16>, vector<16x16xbf16>, vector<4x16xf32> -> vector<4x16xf32>
    %186 = arith.addf %179, %185 : vector<4x16xf32>
    %c8_177 = arith.constant 8 : index
    %c0_178 = arith.constant 0 : index
    %c0_179 = arith.constant 0 : index
    %c0_180 = arith.constant 0 : index
    %187 = vector.load %arg7[%c8_177, %c0_178, %c0_179, %c0_180] : memref<16x3x3x16xbf16, #tpu.memory_space<vmem>>, vector<1x2x2x16xbf16>
    %188 = vector.shape_cast %187 : vector<1x2x2x16xbf16> to vector<2x2x16xbf16>
    %189 = vector.shape_cast %188 : vector<2x2x16xbf16> to vector<4x16xbf16>
    %c6_181 = arith.constant 6 : index
    %c0_182 = arith.constant 0 : index
    %c0_183 = arith.constant 0 : index
    %190 = vector.load %arg4[%c6_181, %c0_182, %c0_183] : memref<9x16x16xbf16, #tpu.memory_space<vmem>>, vector<1x16x16xbf16>
    %191 = vector.shape_cast %190 : vector<1x16x16xbf16> to vector<16x16xbf16>
    %cst_184 = arith.constant dense<0.000000e+00> : vector<4x16xf32>
    %192 = tpu.matmul %189, %191, %cst_184 {dimension_numbers = #tpu.dot_dimension_numbers<[1], [0], [0], [1], [0, 0, 1, 1], [], []>} : vector<4x16xbf16>, vector<16x16xbf16>, vector<4x16xf32> -> vector<4x16xf32>
    %193 = arith.addf %186, %192 : vector<4x16xf32>
    %c9_185 = arith.constant 9 : index
    %c0_186 = arith.constant 0 : index
    %c0_187 = arith.constant 0 : index
    %c0_188 = arith.constant 0 : index
    %194 = vector.load %arg7[%c9_185, %c0_186, %c0_187, %c0_188] : memref<16x3x3x16xbf16, #tpu.memory_space<vmem>>, vector<1x2x2x16xbf16>
    %195 = vector.shape_cast %194 : vector<1x2x2x16xbf16> to vector<2x2x16xbf16>
    %196 = vector.shape_cast %195 : vector<2x2x16xbf16> to vector<4x16xbf16>
    %c7_189 = arith.constant 7 : index
    %c0_190 = arith.constant 0 : index
    %c0_191 = arith.constant 0 : index
    %197 = vector.load %arg4[%c7_189, %c0_190, %c0_191] : memref<9x16x16xbf16, #tpu.memory_space<vmem>>, vector<1x16x16xbf16>
    %198 = vector.shape_cast %197 : vector<1x16x16xbf16> to vector<16x16xbf16>
    %cst_192 = arith.constant dense<0.000000e+00> : vector<4x16xf32>
    %199 = tpu.matmul %196, %198, %cst_192 {dimension_numbers = #tpu.dot_dimension_numbers<[1], [0], [0], [1], [0, 0, 1, 1], [], []>} : vector<4x16xbf16>, vector<16x16xbf16>, vector<4x16xf32> -> vector<4x16xf32>
    %200 = arith.addf %193, %199 : vector<4x16xf32>
    %c10_193 = arith.constant 10 : index
    %c0_194 = arith.constant 0 : index
    %c0_195 = arith.constant 0 : index
    %c0_196 = arith.constant 0 : index
    %201 = vector.load %arg7[%c10_193, %c0_194, %c0_195, %c0_196] : memref<16x3x3x16xbf16, #tpu.memory_space<vmem>>, vector<1x2x2x16xbf16>
    %202 = vector.shape_cast %201 : vector<1x2x2x16xbf16> to vector<2x2x16xbf16>
    %203 = vector.shape_cast %202 : vector<2x2x16xbf16> to vector<4x16xbf16>
    %c8_197 = arith.constant 8 : index
    %c0_198 = arith.constant 0 : index
    %c0_199 = arith.constant 0 : index
    %204 = vector.load %arg4[%c8_197, %c0_198, %c0_199] : memref<9x16x16xbf16, #tpu.memory_space<vmem>>, vector<1x16x16xbf16>
    %205 = vector.shape_cast %204 : vector<1x16x16xbf16> to vector<16x16xbf16>
    %cst_200 = arith.constant dense<0.000000e+00> : vector<4x16xf32>
    %206 = tpu.matmul %203, %205, %cst_200 {dimension_numbers = #tpu.dot_dimension_numbers<[1], [0], [0], [1], [0, 0, 1, 1], [], []>} : vector<4x16xbf16>, vector<16x16xbf16>, vector<4x16xf32> -> vector<4x16xf32>
    %207 = arith.addf %200, %206 : vector<4x16xf32>
    %208 = vector.broadcast %143 : vector<1x16xf32> to vector<4x16xf32>
    %209 = arith.addf %207, %208 : vector<4x16xf32>
    %cst_201 = arith.constant 0.000000e+00 : f32
    %210 = vector.broadcast %cst_201 : f32 to vector<4x16xf32>
    %c2_202 = arith.constant 2 : index
    %c0_203 = arith.constant 0 : index
    %c0_204 = arith.constant 0 : index
    %c0_205 = arith.constant 0 : index
    %211 = vector.load %arg7[%c2_202, %c0_203, %c0_204, %c0_205] : memref<16x3x3x16xbf16, #tpu.memory_space<vmem>>, vector<1x2x2x16xbf16>
    %212 = vector.shape_cast %211 : vector<1x2x2x16xbf16> to vector<2x2x16xbf16>
    %213 = vector.shape_cast %212 : vector<2x2x16xbf16> to vector<4x16xbf16>
    %c0_206 = arith.constant 0 : index
    %c0_207 = arith.constant 0 : index
    %c0_208 = arith.constant 0 : index
    %214 = vector.load %arg4[%c0_206, %c0_207, %c0_208] : memref<9x16x16xbf16, #tpu.memory_space<vmem>>, vector<1x16x16xbf16>
    %215 = vector.shape_cast %214 : vector<1x16x16xbf16> to vector<16x16xbf16>
    %cst_209 = arith.constant dense<0.000000e+00> : vector<4x16xf32>
    %216 = tpu.matmul %213, %215, %cst_209 {dimension_numbers = #tpu.dot_dimension_numbers<[1], [0], [0], [1], [0, 0, 1, 1], [], []>} : vector<4x16xbf16>, vector<16x16xbf16>, vector<4x16xf32> -> vector<4x16xf32>
    %217 = arith.addf %210, %216 : vector<4x16xf32>
    %c3_210 = arith.constant 3 : index
    %c0_211 = arith.constant 0 : index
    %c0_212 = arith.constant 0 : index
    %c0_213 = arith.constant 0 : index
    %218 = vector.load %arg7[%c3_210, %c0_211, %c0_212, %c0_213] : memref<16x3x3x16xbf16, #tpu.memory_space<vmem>>, vector<1x2x2x16xbf16>
    %219 = vector.shape_cast %218 : vector<1x2x2x16xbf16> to vector<2x2x16xbf16>
    %220 = vector.shape_cast %219 : vector<2x2x16xbf16> to vector<4x16xbf16>
    %c1_214 = arith.constant 1 : index
    %c0_215 = arith.constant 0 : index
    %c0_216 = arith.constant 0 : index
    %221 = vector.load %arg4[%c1_214, %c0_215, %c0_216] : memref<9x16x16xbf16, #tpu.memory_space<vmem>>, vector<1x16x16xbf16>
    %222 = vector.shape_cast %221 : vector<1x16x16xbf16> to vector<16x16xbf16>
    %cst_217 = arith.constant dense<0.000000e+00> : vector<4x16xf32>
    %223 = tpu.matmul %220, %222, %cst_217 {dimension_numbers = #tpu.dot_dimension_numbers<[1], [0], [0], [1], [0, 0, 1, 1], [], []>} : vector<4x16xbf16>, vector<16x16xbf16>, vector<4x16xf32> -> vector<4x16xf32>
    %224 = arith.addf %217, %223 : vector<4x16xf32>
    %c0_218 = arith.constant 0 : index
    %c0_219 = arith.constant 0 : index
    %c1_220 = arith.constant 1 : index
    %c0_221 = arith.constant 0 : index
    %225 = vector.load %arg7[%c0_218, %c0_219, %c1_220, %c0_221] : memref<16x3x3x16xbf16, #tpu.memory_space<vmem>>, vector<1x2x2x16xbf16>
    %226 = vector.shape_cast %225 : vector<1x2x2x16xbf16> to vector<2x2x16xbf16>
    %227 = vector.shape_cast %226 : vector<2x2x16xbf16> to vector<4x16xbf16>
    %c2_222 = arith.constant 2 : index
    %c0_223 = arith.constant 0 : index
    %c0_224 = arith.constant 0 : index
    %228 = vector.load %arg4[%c2_222, %c0_223, %c0_224] : memref<9x16x16xbf16, #tpu.memory_space<vmem>>, vector<1x16x16xbf16>
    %229 = vector.shape_cast %228 : vector<1x16x16xbf16> to vector<16x16xbf16>
    %cst_225 = arith.constant dense<0.000000e+00> : vector<4x16xf32>
    %230 = tpu.matmul %227, %229, %cst_225 {dimension_numbers = #tpu.dot_dimension_numbers<[1], [0], [0], [1], [0, 0, 1, 1], [], []>} : vector<4x16xbf16>, vector<16x16xbf16>, vector<4x16xf32> -> vector<4x16xf32>
    %231 = arith.addf %224, %230 : vector<4x16xf32>
    %c6_226 = arith.constant 6 : index
    %c0_227 = arith.constant 0 : index
    %c0_228 = arith.constant 0 : index
    %c0_229 = arith.constant 0 : index
    %232 = vector.load %arg7[%c6_226, %c0_227, %c0_228, %c0_229] : memref<16x3x3x16xbf16, #tpu.memory_space<vmem>>, vector<1x2x2x16xbf16>
    %233 = vector.shape_cast %232 : vector<1x2x2x16xbf16> to vector<2x2x16xbf16>
    %234 = vector.shape_cast %233 : vector<2x2x16xbf16> to vector<4x16xbf16>
    %c3_230 = arith.constant 3 : index
    %c0_231 = arith.constant 0 : index
    %c0_232 = arith.constant 0 : index
    %235 = vector.load %arg4[%c3_230, %c0_231, %c0_232] : memref<9x16x16xbf16, #tpu.memory_space<vmem>>, vector<1x16x16xbf16>
    %236 = vector.shape_cast %235 : vector<1x16x16xbf16> to vector<16x16xbf16>
    %cst_233 = arith.constant dense<0.000000e+00> : vector<4x16xf32>
    %237 = tpu.matmul %234, %236, %cst_233 {dimension_numbers = #tpu.dot_dimension_numbers<[1], [0], [0], [1], [0, 0, 1, 1], [], []>} : vector<4x16xbf16>, vector<16x16xbf16>, vector<4x16xf32> -> vector<4x16xf32>
    %238 = arith.addf %231, %237 : vector<4x16xf32>
    %c7_234 = arith.constant 7 : index
    %c0_235 = arith.constant 0 : index
    %c0_236 = arith.constant 0 : index
    %c0_237 = arith.constant 0 : index
    %239 = vector.load %arg7[%c7_234, %c0_235, %c0_236, %c0_237] : memref<16x3x3x16xbf16, #tpu.memory_space<vmem>>, vector<1x2x2x16xbf16>
    %240 = vector.shape_cast %239 : vector<1x2x2x16xbf16> to vector<2x2x16xbf16>
    %241 = vector.shape_cast %240 : vector<2x2x16xbf16> to vector<4x16xbf16>
    %c4_238 = arith.constant 4 : index
    %c0_239 = arith.constant 0 : index
    %c0_240 = arith.constant 0 : index
    %242 = vector.load %arg4[%c4_238, %c0_239, %c0_240] : memref<9x16x16xbf16, #tpu.memory_space<vmem>>, vector<1x16x16xbf16>
    %243 = vector.shape_cast %242 : vector<1x16x16xbf16> to vector<16x16xbf16>
    %cst_241 = arith.constant dense<0.000000e+00> : vector<4x16xf32>
    %244 = tpu.matmul %241, %243, %cst_241 {dimension_numbers = #tpu.dot_dimension_numbers<[1], [0], [0], [1], [0, 0, 1, 1], [], []>} : vector<4x16xbf16>, vector<16x16xbf16>, vector<4x16xf32> -> vector<4x16xf32>
    %245 = arith.addf %238, %244 : vector<4x16xf32>
    %c4_242 = arith.constant 4 : index
    %c0_243 = arith.constant 0 : index
    %c1_244 = arith.constant 1 : index
    %c0_245 = arith.constant 0 : index
    %246 = vector.load %arg7[%c4_242, %c0_243, %c1_244, %c0_245] : memref<16x3x3x16xbf16, #tpu.memory_space<vmem>>, vector<1x2x2x16xbf16>
    %247 = vector.shape_cast %246 : vector<1x2x2x16xbf16> to vector<2x2x16xbf16>
    %248 = vector.shape_cast %247 : vector<2x2x16xbf16> to vector<4x16xbf16>
    %c5_246 = arith.constant 5 : index
    %c0_247 = arith.constant 0 : index
    %c0_248 = arith.constant 0 : index
    %249 = vector.load %arg4[%c5_246, %c0_247, %c0_248] : memref<9x16x16xbf16, #tpu.memory_space<vmem>>, vector<1x16x16xbf16>
    %250 = vector.shape_cast %249 : vector<1x16x16xbf16> to vector<16x16xbf16>
    %cst_249 = arith.constant dense<0.000000e+00> : vector<4x16xf32>
    %251 = tpu.matmul %248, %250, %cst_249 {dimension_numbers = #tpu.dot_dimension_numbers<[1], [0], [0], [1], [0, 0, 1, 1], [], []>} : vector<4x16xbf16>, vector<16x16xbf16>, vector<4x16xf32> -> vector<4x16xf32>
    %252 = arith.addf %245, %251 : vector<4x16xf32>
    %c10_250 = arith.constant 10 : index
    %c0_251 = arith.constant 0 : index
    %c0_252 = arith.constant 0 : index
    %c0_253 = arith.constant 0 : index
    %253 = vector.load %arg7[%c10_250, %c0_251, %c0_252, %c0_253] : memref<16x3x3x16xbf16, #tpu.memory_space<vmem>>, vector<1x2x2x16xbf16>
    %254 = vector.shape_cast %253 : vector<1x2x2x16xbf16> to vector<2x2x16xbf16>
    %255 = vector.shape_cast %254 : vector<2x2x16xbf16> to vector<4x16xbf16>
    %c6_254 = arith.constant 6 : index
    %c0_255 = arith.constant 0 : index
    %c0_256 = arith.constant 0 : index
    %256 = vector.load %arg4[%c6_254, %c0_255, %c0_256] : memref<9x16x16xbf16, #tpu.memory_space<vmem>>, vector<1x16x16xbf16>
    %257 = vector.shape_cast %256 : vector<1x16x16xbf16> to vector<16x16xbf16>
    %cst_257 = arith.constant dense<0.000000e+00> : vector<4x16xf32>
    %258 = tpu.matmul %255, %257, %cst_257 {dimension_numbers = #tpu.dot_dimension_numbers<[1], [0], [0], [1], [0, 0, 1, 1], [], []>} : vector<4x16xbf16>, vector<16x16xbf16>, vector<4x16xf32> -> vector<4x16xf32>
    %259 = arith.addf %252, %258 : vector<4x16xf32>
    %c11_258 = arith.constant 11 : index
    %c0_259 = arith.constant 0 : index
    %c0_260 = arith.constant 0 : index
    %c0_261 = arith.constant 0 : index
    %260 = vector.load %arg7[%c11_258, %c0_259, %c0_260, %c0_261] : memref<16x3x3x16xbf16, #tpu.memory_space<vmem>>, vector<1x2x2x16xbf16>
    %261 = vector.shape_cast %260 : vector<1x2x2x16xbf16> to vector<2x2x16xbf16>
    %262 = vector.shape_cast %261 : vector<2x2x16xbf16> to vector<4x16xbf16>
    %c7_262 = arith.constant 7 : index
    %c0_263 = arith.constant 0 : index
    %c0_264 = arith.constant 0 : index
    %263 = vector.load %arg4[%c7_262, %c0_263, %c0_264] : memref<9x16x16xbf16, #tpu.memory_space<vmem>>, vector<1x16x16xbf16>
    %264 = vector.shape_cast %263 : vector<1x16x16xbf16> to vector<16x16xbf16>
    %cst_265 = arith.constant dense<0.000000e+00> : vector<4x16xf32>
    %265 = tpu.matmul %262, %264, %cst_265 {dimension_numbers = #tpu.dot_dimension_numbers<[1], [0], [0], [1], [0, 0, 1, 1], [], []>} : vector<4x16xbf16>, vector<16x16xbf16>, vector<4x16xf32> -> vector<4x16xf32>
    %266 = arith.addf %259, %265 : vector<4x16xf32>
    %c8_266 = arith.constant 8 : index
    %c0_267 = arith.constant 0 : index
    %c1_268 = arith.constant 1 : index
    %c0_269 = arith.constant 0 : index
    %267 = vector.load %arg7[%c8_266, %c0_267, %c1_268, %c0_269] : memref<16x3x3x16xbf16, #tpu.memory_space<vmem>>, vector<1x2x2x16xbf16>
    %268 = vector.shape_cast %267 : vector<1x2x2x16xbf16> to vector<2x2x16xbf16>
    %269 = vector.shape_cast %268 : vector<2x2x16xbf16> to vector<4x16xbf16>
    %c8_270 = arith.constant 8 : index
    %c0_271 = arith.constant 0 : index
    %c0_272 = arith.constant 0 : index
    %270 = vector.load %arg4[%c8_270, %c0_271, %c0_272] : memref<9x16x16xbf16, #tpu.memory_space<vmem>>, vector<1x16x16xbf16>
    %271 = vector.shape_cast %270 : vector<1x16x16xbf16> to vector<16x16xbf16>
    %cst_273 = arith.constant dense<0.000000e+00> : vector<4x16xf32>
    %272 = tpu.matmul %269, %271, %cst_273 {dimension_numbers = #tpu.dot_dimension_numbers<[1], [0], [0], [1], [0, 0, 1, 1], [], []>} : vector<4x16xbf16>, vector<16x16xbf16>, vector<4x16xf32> -> vector<4x16xf32>
    %273 = arith.addf %266, %272 : vector<4x16xf32>
    %274 = vector.broadcast %143 : vector<1x16xf32> to vector<4x16xf32>
    %275 = arith.addf %273, %274 : vector<4x16xf32>
    %276 = arith.maximumf %209, %275 : vector<4x16xf32>
    %cst_274 = arith.constant 0.000000e+00 : f32
    %277 = vector.broadcast %cst_274 : f32 to vector<4x16xf32>
    %c8_275 = arith.constant 8 : index
    %c0_276 = arith.constant 0 : index
    %c0_277 = arith.constant 0 : index
    %c0_278 = arith.constant 0 : index
    %278 = vector.load %arg7[%c8_275, %c0_276, %c0_277, %c0_278] : memref<16x3x3x16xbf16, #tpu.memory_space<vmem>>, vector<1x2x2x16xbf16>
    %279 = vector.shape_cast %278 : vector<1x2x2x16xbf16> to vector<2x2x16xbf16>
    %280 = vector.shape_cast %279 : vector<2x2x16xbf16> to vector<4x16xbf16>
    %c0_279 = arith.constant 0 : index
    %c0_280 = arith.constant 0 : index
    %c0_281 = arith.constant 0 : index
    %281 = vector.load %arg4[%c0_279, %c0_280, %c0_281] : memref<9x16x16xbf16, #tpu.memory_space<vmem>>, vector<1x16x16xbf16>
    %282 = vector.shape_cast %281 : vector<1x16x16xbf16> to vector<16x16xbf16>
    %cst_282 = arith.constant dense<0.000000e+00> : vector<4x16xf32>
    %283 = tpu.matmul %280, %282, %cst_282 {dimension_numbers = #tpu.dot_dimension_numbers<[1], [0], [0], [1], [0, 0, 1, 1], [], []>} : vector<4x16xbf16>, vector<16x16xbf16>, vector<4x16xf32> -> vector<4x16xf32>
    %284 = arith.addf %277, %283 : vector<4x16xf32>
    %c9_283 = arith.constant 9 : index
    %c0_284 = arith.constant 0 : index
    %c0_285 = arith.constant 0 : index
    %c0_286 = arith.constant 0 : index
    %285 = vector.load %arg7[%c9_283, %c0_284, %c0_285, %c0_286] : memref<16x3x3x16xbf16, #tpu.memory_space<vmem>>, vector<1x2x2x16xbf16>
    %286 = vector.shape_cast %285 : vector<1x2x2x16xbf16> to vector<2x2x16xbf16>
    %287 = vector.shape_cast %286 : vector<2x2x16xbf16> to vector<4x16xbf16>
    %c1_287 = arith.constant 1 : index
    %c0_288 = arith.constant 0 : index
    %c0_289 = arith.constant 0 : index
    %288 = vector.load %arg4[%c1_287, %c0_288, %c0_289] : memref<9x16x16xbf16, #tpu.memory_space<vmem>>, vector<1x16x16xbf16>
    %289 = vector.shape_cast %288 : vector<1x16x16xbf16> to vector<16x16xbf16>
    %cst_290 = arith.constant dense<0.000000e+00> : vector<4x16xf32>
    %290 = tpu.matmul %287, %289, %cst_290 {dimension_numbers = #tpu.dot_dimension_numbers<[1], [0], [0], [1], [0, 0, 1, 1], [], []>} : vector<4x16xbf16>, vector<16x16xbf16>, vector<4x16xf32> -> vector<4x16xf32>
    %291 = arith.addf %284, %290 : vector<4x16xf32>
    %c10_291 = arith.constant 10 : index
    %c0_292 = arith.constant 0 : index
    %c0_293 = arith.constant 0 : index
    %c0_294 = arith.constant 0 : index
    %292 = vector.load %arg7[%c10_291, %c0_292, %c0_293, %c0_294] : memref<16x3x3x16xbf16, #tpu.memory_space<vmem>>, vector<1x2x2x16xbf16>
    %293 = vector.shape_cast %292 : vector<1x2x2x16xbf16> to vector<2x2x16xbf16>
    %294 = vector.shape_cast %293 : vector<2x2x16xbf16> to vector<4x16xbf16>
    %c2_295 = arith.constant 2 : index
    %c0_296 = arith.constant 0 : index
    %c0_297 = arith.constant 0 : index
    %295 = vector.load %arg4[%c2_295, %c0_296, %c0_297] : memref<9x16x16xbf16, #tpu.memory_space<vmem>>, vector<1x16x16xbf16>
    %296 = vector.shape_cast %295 : vector<1x16x16xbf16> to vector<16x16xbf16>
    %cst_298 = arith.constant dense<0.000000e+00> : vector<4x16xf32>
    %297 = tpu.matmul %294, %296, %cst_298 {dimension_numbers = #tpu.dot_dimension_numbers<[1], [0], [0], [1], [0, 0, 1, 1], [], []>} : vector<4x16xbf16>, vector<16x16xbf16>, vector<4x16xf32> -> vector<4x16xf32>
    %298 = arith.addf %291, %297 : vector<4x16xf32>
    %c12_299 = arith.constant 12 : index
    %c0_300 = arith.constant 0 : index
    %c0_301 = arith.constant 0 : index
    %c0_302 = arith.constant 0 : index
    %299 = vector.load %arg7[%c12_299, %c0_300, %c0_301, %c0_302] : memref<16x3x3x16xbf16, #tpu.memory_space<vmem>>, vector<1x2x2x16xbf16>
    %300 = vector.shape_cast %299 : vector<1x2x2x16xbf16> to vector<2x2x16xbf16>
    %301 = vector.shape_cast %300 : vector<2x2x16xbf16> to vector<4x16xbf16>
    %c3_303 = arith.constant 3 : index
    %c0_304 = arith.constant 0 : index
    %c0_305 = arith.constant 0 : index
    %302 = vector.load %arg4[%c3_303, %c0_304, %c0_305] : memref<9x16x16xbf16, #tpu.memory_space<vmem>>, vector<1x16x16xbf16>
    %303 = vector.shape_cast %302 : vector<1x16x16xbf16> to vector<16x16xbf16>
    %cst_306 = arith.constant dense<0.000000e+00> : vector<4x16xf32>
    %304 = tpu.matmul %301, %303, %cst_306 {dimension_numbers = #tpu.dot_dimension_numbers<[1], [0], [0], [1], [0, 0, 1, 1], [], []>} : vector<4x16xbf16>, vector<16x16xbf16>, vector<4x16xf32> -> vector<4x16xf32>
    %305 = arith.addf %298, %304 : vector<4x16xf32>
    %c13_307 = arith.constant 13 : index
    %c0_308 = arith.constant 0 : index
    %c0_309 = arith.constant 0 : index
    %c0_310 = arith.constant 0 : index
    %306 = vector.load %arg7[%c13_307, %c0_308, %c0_309, %c0_310] : memref<16x3x3x16xbf16, #tpu.memory_space<vmem>>, vector<1x2x2x16xbf16>
    %307 = vector.shape_cast %306 : vector<1x2x2x16xbf16> to vector<2x2x16xbf16>
    %308 = vector.shape_cast %307 : vector<2x2x16xbf16> to vector<4x16xbf16>
    %c4_311 = arith.constant 4 : index
    %c0_312 = arith.constant 0 : index
    %c0_313 = arith.constant 0 : index
    %309 = vector.load %arg4[%c4_311, %c0_312, %c0_313] : memref<9x16x16xbf16, #tpu.memory_space<vmem>>, vector<1x16x16xbf16>
    %310 = vector.shape_cast %309 : vector<1x16x16xbf16> to vector<16x16xbf16>
    %cst_314 = arith.constant dense<0.000000e+00> : vector<4x16xf32>
    %311 = tpu.matmul %308, %310, %cst_314 {dimension_numbers = #tpu.dot_dimension_numbers<[1], [0], [0], [1], [0, 0, 1, 1], [], []>} : vector<4x16xbf16>, vector<16x16xbf16>, vector<4x16xf32> -> vector<4x16xf32>
    %312 = arith.addf %305, %311 : vector<4x16xf32>
    %c14_315 = arith.constant 14 : index
    %c0_316 = arith.constant 0 : index
    %c0_317 = arith.constant 0 : index
    %c0_318 = arith.constant 0 : index
    %313 = vector.load %arg7[%c14_315, %c0_316, %c0_317, %c0_318] : memref<16x3x3x16xbf16, #tpu.memory_space<vmem>>, vector<1x2x2x16xbf16>
    %314 = vector.shape_cast %313 : vector<1x2x2x16xbf16> to vector<2x2x16xbf16>
    %315 = vector.shape_cast %314 : vector<2x2x16xbf16> to vector<4x16xbf16>
    %c5_319 = arith.constant 5 : index
    %c0_320 = arith.constant 0 : index
    %c0_321 = arith.constant 0 : index
    %316 = vector.load %arg4[%c5_319, %c0_320, %c0_321] : memref<9x16x16xbf16, #tpu.memory_space<vmem>>, vector<1x16x16xbf16>
    %317 = vector.shape_cast %316 : vector<1x16x16xbf16> to vector<16x16xbf16>
    %cst_322 = arith.constant dense<0.000000e+00> : vector<4x16xf32>
    %318 = tpu.matmul %315, %317, %cst_322 {dimension_numbers = #tpu.dot_dimension_numbers<[1], [0], [0], [1], [0, 0, 1, 1], [], []>} : vector<4x16xbf16>, vector<16x16xbf16>, vector<4x16xf32> -> vector<4x16xf32>
    %319 = arith.addf %312, %318 : vector<4x16xf32>
    %c0_323 = arith.constant 0 : index
    %c1_324 = arith.constant 1 : index
    %c0_325 = arith.constant 0 : index
    %c0_326 = arith.constant 0 : index
    %320 = vector.load %arg7[%c0_323, %c1_324, %c0_325, %c0_326] : memref<16x3x3x16xbf16, #tpu.memory_space<vmem>>, vector<1x2x2x16xbf16>
    %321 = vector.shape_cast %320 : vector<1x2x2x16xbf16> to vector<2x2x16xbf16>
    %322 = vector.shape_cast %321 : vector<2x2x16xbf16> to vector<4x16xbf16>
    %c6_327 = arith.constant 6 : index
    %c0_328 = arith.constant 0 : index
    %c0_329 = arith.constant 0 : index
    %323 = vector.load %arg4[%c6_327, %c0_328, %c0_329] : memref<9x16x16xbf16, #tpu.memory_space<vmem>>, vector<1x16x16xbf16>
    %324 = vector.shape_cast %323 : vector<1x16x16xbf16> to vector<16x16xbf16>
    %cst_330 = arith.constant dense<0.000000e+00> : vector<4x16xf32>
    %325 = tpu.matmul %322, %324, %cst_330 {dimension_numbers = #tpu.dot_dimension_numbers<[1], [0], [0], [1], [0, 0, 1, 1], [], []>} : vector<4x16xbf16>, vector<16x16xbf16>, vector<4x16xf32> -> vector<4x16xf32>
    %326 = arith.addf %319, %325 : vector<4x16xf32>
    %c1_331 = arith.constant 1 : index
    %c1_332 = arith.constant 1 : index
    %c0_333 = arith.constant 0 : index
    %c0_334 = arith.constant 0 : index
    %327 = vector.load %arg7[%c1_331, %c1_332, %c0_333, %c0_334] : memref<16x3x3x16xbf16, #tpu.memory_space<vmem>>, vector<1x2x2x16xbf16>
    %328 = vector.shape_cast %327 : vector<1x2x2x16xbf16> to vector<2x2x16xbf16>
    %329 = vector.shape_cast %328 : vector<2x2x16xbf16> to vector<4x16xbf16>
    %c7_335 = arith.constant 7 : index
    %c0_336 = arith.constant 0 : index
    %c0_337 = arith.constant 0 : index
    %330 = vector.load %arg4[%c7_335, %c0_336, %c0_337] : memref<9x16x16xbf16, #tpu.memory_space<vmem>>, vector<1x16x16xbf16>
    %331 = vector.shape_cast %330 : vector<1x16x16xbf16> to vector<16x16xbf16>
    %cst_338 = arith.constant dense<0.000000e+00> : vector<4x16xf32>
    %332 = tpu.matmul %329, %331, %cst_338 {dimension_numbers = #tpu.dot_dimension_numbers<[1], [0], [0], [1], [0, 0, 1, 1], [], []>} : vector<4x16xbf16>, vector<16x16xbf16>, vector<4x16xf32> -> vector<4x16xf32>
    %333 = arith.addf %326, %332 : vector<4x16xf32>
    %c2_339 = arith.constant 2 : index
    %c1_340 = arith.constant 1 : index
    %c0_341 = arith.constant 0 : index
    %c0_342 = arith.constant 0 : index
    %334 = vector.load %arg7[%c2_339, %c1_340, %c0_341, %c0_342] : memref<16x3x3x16xbf16, #tpu.memory_space<vmem>>, vector<1x2x2x16xbf16>
    %335 = vector.shape_cast %334 : vector<1x2x2x16xbf16> to vector<2x2x16xbf16>
    %336 = vector.shape_cast %335 : vector<2x2x16xbf16> to vector<4x16xbf16>
    %c8_343 = arith.constant 8 : index
    %c0_344 = arith.constant 0 : index
    %c0_345 = arith.constant 0 : index
    %337 = vector.load %arg4[%c8_343, %c0_344, %c0_345] : memref<9x16x16xbf16, #tpu.memory_space<vmem>>, vector<1x16x16xbf16>
    %338 = vector.shape_cast %337 : vector<1x16x16xbf16> to vector<16x16xbf16>
    %cst_346 = arith.constant dense<0.000000e+00> : vector<4x16xf32>
    %339 = tpu.matmul %336, %338, %cst_346 {dimension_numbers = #tpu.dot_dimension_numbers<[1], [0], [0], [1], [0, 0, 1, 1], [], []>} : vector<4x16xbf16>, vector<16x16xbf16>, vector<4x16xf32> -> vector<4x16xf32>
    %340 = arith.addf %333, %339 : vector<4x16xf32>
    %341 = vector.broadcast %143 : vector<1x16xf32> to vector<4x16xf32>
    %342 = arith.addf %340, %341 : vector<4x16xf32>
    %343 = arith.maximumf %276, %342 : vector<4x16xf32>
    %cst_347 = arith.constant 0.000000e+00 : f32
    %344 = vector.broadcast %cst_347 : f32 to vector<4x16xf32>
    %c10_348 = arith.constant 10 : index
    %c0_349 = arith.constant 0 : index
    %c0_350 = arith.constant 0 : index
    %c0_351 = arith.constant 0 : index
    %345 = vector.load %arg7[%c10_348, %c0_349, %c0_350, %c0_351] : memref<16x3x3x16xbf16, #tpu.memory_space<vmem>>, vector<1x2x2x16xbf16>
    %346 = vector.shape_cast %345 : vector<1x2x2x16xbf16> to vector<2x2x16xbf16>
    %347 = vector.shape_cast %346 : vector<2x2x16xbf16> to vector<4x16xbf16>
    %c0_352 = arith.constant 0 : index
    %c0_353 = arith.constant 0 : index
    %c0_354 = arith.constant 0 : index
    %348 = vector.load %arg4[%c0_352, %c0_353, %c0_354] : memref<9x16x16xbf16, #tpu.memory_space<vmem>>, vector<1x16x16xbf16>
    %349 = vector.shape_cast %348 : vector<1x16x16xbf16> to vector<16x16xbf16>
    %cst_355 = arith.constant dense<0.000000e+00> : vector<4x16xf32>
    %350 = tpu.matmul %347, %349, %cst_355 {dimension_numbers = #tpu.dot_dimension_numbers<[1], [0], [0], [1], [0, 0, 1, 1], [], []>} : vector<4x16xbf16>, vector<16x16xbf16>, vector<4x16xf32> -> vector<4x16xf32>
    %351 = arith.addf %344, %350 : vector<4x16xf32>
    %c11_356 = arith.constant 11 : index
    %c0_357 = arith.constant 0 : index
    %c0_358 = arith.constant 0 : index
    %c0_359 = arith.constant 0 : index
    %352 = vector.load %arg7[%c11_356, %c0_357, %c0_358, %c0_359] : memref<16x3x3x16xbf16, #tpu.memory_space<vmem>>, vector<1x2x2x16xbf16>
    %353 = vector.shape_cast %352 : vector<1x2x2x16xbf16> to vector<2x2x16xbf16>
    %354 = vector.shape_cast %353 : vector<2x2x16xbf16> to vector<4x16xbf16>
    %c1_360 = arith.constant 1 : index
    %c0_361 = arith.constant 0 : index
    %c0_362 = arith.constant 0 : index
    %355 = vector.load %arg4[%c1_360, %c0_361, %c0_362] : memref<9x16x16xbf16, #tpu.memory_space<vmem>>, vector<1x16x16xbf16>
    %356 = vector.shape_cast %355 : vector<1x16x16xbf16> to vector<16x16xbf16>
    %cst_363 = arith.constant dense<0.000000e+00> : vector<4x16xf32>
    %357 = tpu.matmul %354, %356, %cst_363 {dimension_numbers = #tpu.dot_dimension_numbers<[1], [0], [0], [1], [0, 0, 1, 1], [], []>} : vector<4x16xbf16>, vector<16x16xbf16>, vector<4x16xf32> -> vector<4x16xf32>
    %358 = arith.addf %351, %357 : vector<4x16xf32>
    %c8_364 = arith.constant 8 : index
    %c0_365 = arith.constant 0 : index
    %c1_366 = arith.constant 1 : index
    %c0_367 = arith.constant 0 : index
    %359 = vector.load %arg7[%c8_364, %c0_365, %c1_366, %c0_367] : memref<16x3x3x16xbf16, #tpu.memory_space<vmem>>, vector<1x2x2x16xbf16>
    %360 = vector.shape_cast %359 : vector<1x2x2x16xbf16> to vector<2x2x16xbf16>
    %361 = vector.shape_cast %360 : vector<2x2x16xbf16> to vector<4x16xbf16>
    %c2_368 = arith.constant 2 : index
    %c0_369 = arith.constant 0 : index
    %c0_370 = arith.constant 0 : index
    %362 = vector.load %arg4[%c2_368, %c0_369, %c0_370] : memref<9x16x16xbf16, #tpu.memory_space<vmem>>, vector<1x16x16xbf16>
    %363 = vector.shape_cast %362 : vector<1x16x16xbf16> to vector<16x16xbf16>
    %cst_371 = arith.constant dense<0.000000e+00> : vector<4x16xf32>
    %364 = tpu.matmul %361, %363, %cst_371 {dimension_numbers = #tpu.dot_dimension_numbers<[1], [0], [0], [1], [0, 0, 1, 1], [], []>} : vector<4x16xbf16>, vector<16x16xbf16>, vector<4x16xf32> -> vector<4x16xf32>
    %365 = arith.addf %358, %364 : vector<4x16xf32>
    %c14_372 = arith.constant 14 : index
    %c0_373 = arith.constant 0 : index
    %c0_374 = arith.constant 0 : index
    %c0_375 = arith.constant 0 : index
    %366 = vector.load %arg7[%c14_372, %c0_373, %c0_374, %c0_375] : memref<16x3x3x16xbf16, #tpu.memory_space<vmem>>, vector<1x2x2x16xbf16>
    %367 = vector.shape_cast %366 : vector<1x2x2x16xbf16> to vector<2x2x16xbf16>
    %368 = vector.shape_cast %367 : vector<2x2x16xbf16> to vector<4x16xbf16>
    %c3_376 = arith.constant 3 : index
    %c0_377 = arith.constant 0 : index
    %c0_378 = arith.constant 0 : index
    %369 = vector.load %arg4[%c3_376, %c0_377, %c0_378] : memref<9x16x16xbf16, #tpu.memory_space<vmem>>, vector<1x16x16xbf16>
    %370 = vector.shape_cast %369 : vector<1x16x16xbf16> to vector<16x16xbf16>
    %cst_379 = arith.constant dense<0.000000e+00> : vector<4x16xf32>
    %371 = tpu.matmul %368, %370, %cst_379 {dimension_numbers = #tpu.dot_dimension_numbers<[1], [0], [0], [1], [0, 0, 1, 1], [], []>} : vector<4x16xbf16>, vector<16x16xbf16>, vector<4x16xf32> -> vector<4x16xf32>
    %372 = arith.addf %365, %371 : vector<4x16xf32>
    %c15_380 = arith.constant 15 : index
    %c0_381 = arith.constant 0 : index
    %c0_382 = arith.constant 0 : index
    %c0_383 = arith.constant 0 : index
    %373 = vector.load %arg7[%c15_380, %c0_381, %c0_382, %c0_383] : memref<16x3x3x16xbf16, #tpu.memory_space<vmem>>, vector<1x2x2x16xbf16>
    %374 = vector.shape_cast %373 : vector<1x2x2x16xbf16> to vector<2x2x16xbf16>
    %375 = vector.shape_cast %374 : vector<2x2x16xbf16> to vector<4x16xbf16>
    %c4_384 = arith.constant 4 : index
    %c0_385 = arith.constant 0 : index
    %c0_386 = arith.constant 0 : index
    %376 = vector.load %arg4[%c4_384, %c0_385, %c0_386] : memref<9x16x16xbf16, #tpu.memory_space<vmem>>, vector<1x16x16xbf16>
    %377 = vector.shape_cast %376 : vector<1x16x16xbf16> to vector<16x16xbf16>
    %cst_387 = arith.constant dense<0.000000e+00> : vector<4x16xf32>
    %378 = tpu.matmul %375, %377, %cst_387 {dimension_numbers = #tpu.dot_dimension_numbers<[1], [0], [0], [1], [0, 0, 1, 1], [], []>} : vector<4x16xbf16>, vector<16x16xbf16>, vector<4x16xf32> -> vector<4x16xf32>
    %379 = arith.addf %372, %378 : vector<4x16xf32>
    %c12_388 = arith.constant 12 : index
    %c0_389 = arith.constant 0 : index
    %c1_390 = arith.constant 1 : index
    %c0_391 = arith.constant 0 : index
    %380 = vector.load %arg7[%c12_388, %c0_389, %c1_390, %c0_391] : memref<16x3x3x16xbf16, #tpu.memory_space<vmem>>, vector<1x2x2x16xbf16>
    %381 = vector.shape_cast %380 : vector<1x2x2x16xbf16> to vector<2x2x16xbf16>
    %382 = vector.shape_cast %381 : vector<2x2x16xbf16> to vector<4x16xbf16>
    %c5_392 = arith.constant 5 : index
    %c0_393 = arith.constant 0 : index
    %c0_394 = arith.constant 0 : index
    %383 = vector.load %arg4[%c5_392, %c0_393, %c0_394] : memref<9x16x16xbf16, #tpu.memory_space<vmem>>, vector<1x16x16xbf16>
    %384 = vector.shape_cast %383 : vector<1x16x16xbf16> to vector<16x16xbf16>
    %cst_395 = arith.constant dense<0.000000e+00> : vector<4x16xf32>
    %385 = tpu.matmul %382, %384, %cst_395 {dimension_numbers = #tpu.dot_dimension_numbers<[1], [0], [0], [1], [0, 0, 1, 1], [], []>} : vector<4x16xbf16>, vector<16x16xbf16>, vector<4x16xf32> -> vector<4x16xf32>
    %386 = arith.addf %379, %385 : vector<4x16xf32>
    %c2_396 = arith.constant 2 : index
    %c1_397 = arith.constant 1 : index
    %c0_398 = arith.constant 0 : index
    %c0_399 = arith.constant 0 : index
    %387 = vector.load %arg7[%c2_396, %c1_397, %c0_398, %c0_399] : memref<16x3x3x16xbf16, #tpu.memory_space<vmem>>, vector<1x2x2x16xbf16>
    %388 = vector.shape_cast %387 : vector<1x2x2x16xbf16> to vector<2x2x16xbf16>
    %389 = vector.shape_cast %388 : vector<2x2x16xbf16> to vector<4x16xbf16>
    %c6_400 = arith.constant 6 : index
    %c0_401 = arith.constant 0 : index
    %c0_402 = arith.constant 0 : index
    %390 = vector.load %arg4[%c6_400, %c0_401, %c0_402] : memref<9x16x16xbf16, #tpu.memory_space<vmem>>, vector<1x16x16xbf16>
    %391 = vector.shape_cast %390 : vector<1x16x16xbf16> to vector<16x16xbf16>
    %cst_403 = arith.constant dense<0.000000e+00> : vector<4x16xf32>
    %392 = tpu.matmul %389, %391, %cst_403 {dimension_numbers = #tpu.dot_dimension_numbers<[1], [0], [0], [1], [0, 0, 1, 1], [], []>} : vector<4x16xbf16>, vector<16x16xbf16>, vector<4x16xf32> -> vector<4x16xf32>
    %393 = arith.addf %386, %392 : vector<4x16xf32>
    %c3_404 = arith.constant 3 : index
    %c1_405 = arith.constant 1 : index
    %c0_406 = arith.constant 0 : index
    %c0_407 = arith.constant 0 : index
    %394 = vector.load %arg7[%c3_404, %c1_405, %c0_406, %c0_407] : memref<16x3x3x16xbf16, #tpu.memory_space<vmem>>, vector<1x2x2x16xbf16>
    %395 = vector.shape_cast %394 : vector<1x2x2x16xbf16> to vector<2x2x16xbf16>
    %396 = vector.shape_cast %395 : vector<2x2x16xbf16> to vector<4x16xbf16>
    %c7_408 = arith.constant 7 : index
    %c0_409 = arith.constant 0 : index
    %c0_410 = arith.constant 0 : index
    %397 = vector.load %arg4[%c7_408, %c0_409, %c0_410] : memref<9x16x16xbf16, #tpu.memory_space<vmem>>, vector<1x16x16xbf16>
    %398 = vector.shape_cast %397 : vector<1x16x16xbf16> to vector<16x16xbf16>
    %cst_411 = arith.constant dense<0.000000e+00> : vector<4x16xf32>
    %399 = tpu.matmul %396, %398, %cst_411 {dimension_numbers = #tpu.dot_dimension_numbers<[1], [0], [0], [1], [0, 0, 1, 1], [], []>} : vector<4x16xbf16>, vector<16x16xbf16>, vector<4x16xf32> -> vector<4x16xf32>
    %400 = arith.addf %393, %399 : vector<4x16xf32>
    %c0_412 = arith.constant 0 : index
    %c1_413 = arith.constant 1 : index
    %c1_414 = arith.constant 1 : index
    %c0_415 = arith.constant 0 : index
    %401 = vector.load %arg7[%c0_412, %c1_413, %c1_414, %c0_415] : memref<16x3x3x16xbf16, #tpu.memory_space<vmem>>, vector<1x2x2x16xbf16>
    %402 = vector.shape_cast %401 : vector<1x2x2x16xbf16> to vector<2x2x16xbf16>
    %403 = vector.shape_cast %402 : vector<2x2x16xbf16> to vector<4x16xbf16>
    %c8_416 = arith.constant 8 : index
    %c0_417 = arith.constant 0 : index
    %c0_418 = arith.constant 0 : index
    %404 = vector.load %arg4[%c8_416, %c0_417, %c0_418] : memref<9x16x16xbf16, #tpu.memory_space<vmem>>, vector<1x16x16xbf16>
    %405 = vector.shape_cast %404 : vector<1x16x16xbf16> to vector<16x16xbf16>
    %cst_419 = arith.constant dense<0.000000e+00> : vector<4x16xf32>
    %406 = tpu.matmul %403, %405, %cst_419 {dimension_numbers = #tpu.dot_dimension_numbers<[1], [0], [0], [1], [0, 0, 1, 1], [], []>} : vector<4x16xbf16>, vector<16x16xbf16>, vector<4x16xf32> -> vector<4x16xf32>
    %407 = arith.addf %400, %406 : vector<4x16xf32>
    %408 = vector.broadcast %143 : vector<1x16xf32> to vector<4x16xf32>
    %409 = arith.addf %407, %408 : vector<4x16xf32>
    %410 = arith.maximumf %343, %409 : vector<4x16xf32>
    %c0_420 = arith.constant 0 : index
    %c0_421 = arith.constant 0 : index
    %c0_422 = arith.constant 0 : index
    %411 = vector.load %arg6[%c0_420, %c0_421, %c0_422] : memref<1x4x16xf32, #tpu.memory_space<vmem>>, vector<1x4x16xf32>
    %412 = vector.shape_cast %411 : vector<1x4x16xf32> to vector<4x16xf32>
    %413 = vector.shape_cast %410 : vector<4x16xf32> to vector<1x4x16xf32>
    tpu.vector_store %arg6[%c0_420, %c0_421, %c0_422], %413 {strides = array<i32>} : memref<1x4x16xf32, #tpu.memory_space<vmem>>, vector<1x4x16xf32>,
    return
  }
  func.func @transform_0(%arg0: i32) -> (i32, i32, i32) {
    %c0_i32 = arith.constant 0 : i32
    %c0_i32_0 = arith.constant 0 : i32
    %c0_i32_1 = arith.constant 0 : i32
    return %arg0, %c0_i32, %c0_i32_0 : i32, i32, i32
  }
  func.func @transform_1(%arg0: i32) -> (i32, i32) {
    %c0_i32 = arith.constant 0 : i32
    %c0_i32_0 = arith.constant 0 : i32
    %c0_i32_1 = arith.constant 0 : i32
    return %c0_i32, %c0_i32_0 : i32, i32
  }
  func.func @transform_2(%arg0: i32) -> (i32, i32) {
    %c0_i32 = arith.constant 0 : i32
    %c0_i32_0 = arith.constant 0 : i32
    %c0_i32_1 = arith.constant 0 : i32
    return %c0_i32, %c0_i32_0 : i32, i32
  }
  func.func @transform_3(%arg0: i32) -> (i32, i32, i32) {
    %c0_i32 = arith.constant 0 : i32
    %c0_i32_0 = arith.constant 0 : i32
    %c0_i32_1 = arith.constant 0 : i32
    %c0_i32_2 = arith.constant 0 : i32
    return %c0_i32, %c0_i32_0, %c0_i32_1 : i32, i32, i32
  }
  func.func @transform_4(%arg0: i32) -> (i32, i32) {
    %c0_i32 = arith.constant 0 : i32
    %c0_i32_0 = arith.constant 0 : i32
    %c0_i32_1 = arith.constant 0 : i32
    return %c0_i32, %c0_i32_0 : i32, i32
  }
  func.func @transform_5(%arg0: i32) -> (i32, i32, i32) {
    %c0_i32 = arith.constant 0 : i32
    %c0_i32_0 = arith.constant 0 : i32
    %c0_i32_1 = arith.constant 0 : i32
    return %arg0, %c0_i32, %c0_i32_0 : i32, i32, i32
  }
}

</mosaic_0001>

<bundles_post_ra>
// kernel: map_block_forward.1
= control target key start
LH: loop header
LB: loop body
LE: loop exit
PB: predicated region body
PF: predicated region fallthrough
CT: control target
= control target key end

     0   :  { %10 = vsyncpa [#allocation4], 0  ;;  %s4400_s0 = inlined_call_operand.vmem [shape: bf16[2,64,36], index: 0, kind: input, shape index: {}]   ;;  %s4401_s1 = inlined_call_operand.vmem [shape: bf16[36,16], index: 1, kind: input, shape index: {}]   ;;  %s4402_s2 = inlined_call_operand.vmem [shape: f32[1,16], index: 2, kind: input, shape index: {}]   ;;  %s4403_s3 = inlined_call_operand.vmem [shape: bf16[9,16,16], index: 3, kind: input, shape index: {}]   ;;  %s4404_s4 = inlined_call_operand.vmem [shape: f32[1,16], index: 4, kind: input, shape index: {}]   ;;  %s4405_s5 = inlined_call_operand.hbm [shape: f32[2,4,16], index: 5, kind: output, shape index: {}]  }
   0x1   :  { %12 = vsyncpa [#allocation4 + $0x1], 0  ;;  %s3755_s18 = smov 0   ;;  %s3757_s19 = smov 0  }
   0x2   :  { %s3759_s20 = smov 0   ;;  %s3761_s21 = smov 0  }
   0x3 LB: > { %s3776_s22 = sadd.s32 4294967295, %s3718_s21   ;;  %s3167_s23 = sadd.s32 4294967294, %s3718_s21   ;;  %s3718_s21 = sphi %s3761_s21, %s4419_s21   ;;  %s3714_s20 = sphi %s3759_s20, %s4418_s20   ;;  %s3710_s19 = sphi %s3757_s19, %s4417_s19   ;;  %s3706_s18 = sphi %s3755_s18, %s4416_s18  }
   0x4   : > { %s3780_s24 = sadd.s32 1, %s3718_s21   ;;  %s135_s25 = sadd.s32 1, %s3714_s20 }
   0x5   : > { %s132_s26 = ssub.s32 %s3718_s21, %s3780_s24  ;;  %p145_p0 = scmp.ne.s32.totalorder %s3714_s20, %s3710_s19 }
   0x6   : > { %p133_p1 = scmp.eq.s32.totalorder %s132_s26, 0  ;;  %p146_p2 = scmp.eq.s32.totalorder %s3776_s22, 1 }
   0x7   : > { %p151_p3 = scmp.ne.s32.totalorder %s3710_s19, %s3706_s18  ;;  %p152_p4 = scmp.eq.s32.totalorder %s3167_s23, 1 }
   0x8   : > { %s3791_s27 = scalar_select %p133_p1, %s3714_s20, %s135_s25  }
   0x9   : > { %p3793_p5 = por %p146_p2, %p145_p0  ;;  %p3797_p6 = por %p152_p4, %p151_p3 }
   0xa   : > { %p3170_p7 = scmp.ge.s32.totalorder %s3718_s21, 1  ;;  %p190_p8 = scmp.lt.s32.totalorder %s3718_s21, 3 }
   0xc   : > { %p191_p9 = pnand %p3170_p7, %p190_p8 }
   0xd   : > { %p218_p10 = scmp.lt.s32.totalorder (!%p191_p9), %s3776_s22, 1  ;;  %s215_s6 = sand.u32 (!%p191_p9), 1, %s3710_s19  }
   0xe   : > { %194 = sbr.rel (%p191_p9) target bundleno = 618 (0x26a), region = 40  ;;  %s3171_s7 = sshll.u32 (!%p191_p9), %s215_s6, 2 }
   0xf   : > { %s3285_s8 = sshll.u32 (!%p191_p9), %s3776_s22, 6  ;;  %s217_s9 = scalar_lea.vmem (!%p191_p9), [#allocation3], %s3171_s7 }
  0x10   : > { %s3108_s10 = sshll.u32 (!%p191_p9), %s217_s9, 4  ;;  %s3106_s13 = scalar_lea.hbm (!%p191_p9), %s4405_s5, %s3285_s8  ;;  %s3109_s10 = int_to_ptr.vmem [resolvable:$true] %s3108_s10 }
  0x11   : > { %s3095_s14 = scalar_lea.sflag (!%p191_p9), [#allocation4], %s215_s6 }
  0x13   : > { %v3642_v0 = vld [vmem:[%s4401_s1 + $0x10] ss:$0 sps:$4 sm:$0x33]   ;;  %vm292_vm0 = vcmask 1041408   ;;  %v3643_v1 = vld [vmem:[%s4401_s1 + $0x8] sm:$0xff]   ;;  %v3644_v3 = vld [vmem:[%s4401_s1] sm:$0xff]  }
  0x14   : > { %3598 = vmatprep.subr.msk.bf16.mxu0 %vm292_vm0, %v3642_v0  ;;  %v294_v2 = vsel %vm292_vm0, %v3642_v0, 0  ;;  %s219_s11 = scalar_select %p218_p10, %s3776_s22, 1  ;;  %vm279_vm1 = vcmask 293888   ;;  %vm389_vm2 = vcmask 123904   ;;  %vm390_vm3 = vsmask.f32 1280 }
  0x15   : > { %3369 = vmatpush3.bf16.msra.mxu0 %v294_v2  ;;  %vm3818_vm4 = vmand %vm389_vm2, %vm390_vm3  ;;  %v428_v9 = vld [vmem:[#allocation2 + $0x18] sm:$0x3]  ;;  %v431_v10 = vld [vmem:[#allocation2 + $0x1a] sm:$0x3]  ;;  %vm3721_vm5 = vmmov 0   ;;  %vm570_vm10 = vcmask 122880  }
  0x16   : > { %3370 = vmatprep.subr.bf16.mxu0 %v3643_v1  ;;  %s3288_s12 = sshll.u32 %s219_s11, 5  ;;  %v429_v11 = vsel %vm3818_vm4, 0, %v428_v9  ;;  %v432_v12 = vsel %vm3818_vm4, 0, %v431_v10  ;;  %v437_v13 = vld [vmem:[#allocation2 + $0x1e] sm:$0x3]  ;;  %s3724_s22 = smov [#allocation3]  }
  0x17   : > { %s222_s15 = scalar_lea.vmem %s4400_s0, %s3288_s12  ;;  %v440_v14 = vld [vmem:[#allocation2 + $0x20] sm:$0x3]  ;;  %430 = vst [vmem:[#allocation2 + $0x18] sm:$0x3] %v429_v11  ;;  %433 = vst [vmem:[#allocation2 + $0x1a] sm:$0x3] %v432_v12 }
  0x18   : > { %v3645_v4 = vld [vmem:[%s222_s15] sm:$0xff]   ;;  %v3646_v5 = vld [vmem:[%s222_s15 + $0x8] sm:$0xff]   ;;  %v3647_v6 = vld [vmem:[%s222_s15 + $0x10] sm:$0xff]   ;;  %v438_v15 = vsel %vm3818_vm4, 0, %v437_v13  ;;  %v441_v16 = vsel %vm3818_vm4, 0, %v440_v14  ;;  %s3662_s16 = sshll.u32 %s3724_s22, 4  ;;  %s3663_s16 = int_to_ptr.vmem [resolvable:$false] %s3662_s16 }
  0x19   : > { %3371 = vmatpush3.bf16.msra.mxu0 %v3643_v1  ;;  %3374 = vmatprep.mubr.msk.bf16.mxu0 %vm279_vm1, %v3645_v4  ;;  %v3648_v7 = vld [vmem:[%s222_s15 + $0x18] sm:$0xff]   ;;  %v446_v17 = vld [vmem:[#allocation2 + $0x24] sm:$0x3]  ;;  %v449_v18 = vld [vmem:[#allocation2 + $0x26] sm:$0x3]  ;;  %v3720_v4 = vmov 0.0   ;;  %p3665_p0 = scmp.lt.s32.totalorder %s3109_s10, %s3663_s16 }
  0x1a   : > { %3372 = vmatprep.subr.bf16.mxu0 %v3644_v3  ;;  %439 = vst [vmem:[#allocation2 + $0x1e] sm:$0x3] %v438_v15  ;;  %442 = vst [vmem:[#allocation2 + $0x20] sm:$0x3] %v441_v16  ;;  %v447_v19 = vsel %vm3818_vm4, 0, %v446_v17  ;;  %v450_v20 = vsel %vm3818_vm4, 0, %v449_v18  ;;  %3382 = vmatprep.subr.bf16.mxu1 %v3720_v4 }
  0x1b   : > { %v455_v21 = vld [vmem:[#allocation2 + $0x2a] sm:$0x3]  ;;  %v458_v22 = vld [vmem:[#allocation2 + $0x2c] sm:$0x3]  ;;  %448 = vst [vmem:[#allocation2 + $0x24] sm:$0x3] %v447_v19  ;;  %3384 = vmatprep.mubr.msk.bf16.mxu1 %vm3721_vm5, %v3720_v4 }
  0x1c   : > { %451 = vst [vmem:[#allocation2 + $0x26] sm:$0x3] %v450_v20  ;;  %v456_v23 = vsel %vm3818_vm4, 0, %v455_v21  ;;  %v459_v24 = vsel %vm3818_vm4, 0, %v458_v22  ;;  %v395_v25 = vld [vmem:[#allocation2 + $0x2] sm:$0x3] }
  0x1d   : > { %3373 = vmatpush3.bf16.msra.mxu0 %v3644_v3  ;;  %457 = vst [vmem:[#allocation2 + $0x2a] sm:$0x3] %v456_v23  ;;  %460 = vst [vmem:[#allocation2 + $0x2c] sm:$0x3] %v459_v24  ;;  %v396_v26 = vsel %vm3818_vm4, 0, %v395_v25  ;;  %v3883_v3 = vld [vmem:[%s4403_s3 + $0x8] sm:$0xff]  }
  0x1e   : > { %v398_v27 = vld [vmem:[#allocation2 + $0x4] sm:$0x3]  ;;  %v413_v28 = vld [vmem:[#allocation2 + $0xe] sm:$0x3]  ;;  %397 = vst [vmem:[#allocation2 + $0x2] sm:$0x3] %v396_v26  ;;  %3400 = vmatprep.subr.bf16.mxu0 %v3720_v4  ;;  %3383 = vmatpush3.bf16.msra.mxu1 %v3883_v3 }
  0x1f   : > { %v399_v29 = vsel %vm3818_vm4, 0, %v398_v27  ;;  %v404_v30 = vld [vmem:[#allocation2 + $0x8] sm:$0x3]  ;;  %v414_v31 = vsel %vm3818_vm4, 0, %v413_v28  ;;  %v416_v32 = vld [vmem:[#allocation2 + $0x10] sm:$0x3]  ;;  %3388 = vmatprep.subr.bf16.mxu1 %v3720_v4 }
  0x20   : > { %3375 = vmatmul.mubr.msk.bf16.vlgmr.msra.gmra.mxu0 %vm279_vm1, %v3646_v5  ;;  %400 = vst [vmem:[#allocation2 + $0x4] sm:$0x3] %v399_v29  ;;  %v405_v33 = vsel %vm3818_vm4, 0, %v404_v30  ;;  %415 = vst [vmem:[#allocation2 + $0xe] sm:$0x3] %v414_v31  ;;  %v417_v34 = vsel %vm3818_vm4, 0, %v416_v32 }
  0x21   : > { %3378 = vmatprep.mubr.msk.bf16.mxu0 %vm279_vm1, %v3647_v6  ;;  %v422_v35 = vld [vmem:[#allocation2 + $0x14] sm:$0x3]  ;;  %406 = vst [vmem:[#allocation2 + $0x8] sm:$0x3] %v405_v33  ;;  %v407_v36 = vld [vmem:[#allocation2 + $0xa] sm:$0x3] }
  0x22   : > { %418 = vst [vmem:[#allocation2 + $0x10] sm:$0x3] %v417_v34  ;;  %v423_v37 = vsel %vm3818_vm4, 0, %v422_v35  ;;  %v425_v38 = vld [vmem:[#allocation2 + $0x16] sm:$0x3]  ;;  %v408_v39 = vsel %vm3818_vm4, 0, %v407_v36 }
  0x23   : > { %424 = vst [vmem:[#allocation2 + $0x14] sm:$0x3] %v423_v37  ;;  %v426_v40 = vsel %vm3818_vm4, 0, %v425_v38  ;;  %409 = vst [vmem:[#allocation2 + $0xa] sm:$0x3] %v408_v39  ;;  %v3910_v20 = vld [vmem:[%s4403_s3 + $0x18] sm:$0xff]  }
  0x24   : > { %427 = vst [vmem:[#allocation2 + $0x16] sm:$0x3] %v426_v40  ;;  %v401_v41 = vld [vmem:[#allocation2 + $0x6] sm:$0x3]  ;;  %v410_v43 = vld [vmem:[#allocation2 + $0xc] sm:$0x3]  ;;  %3401 = vmatpush3.bf16.msra.mxu0 %v3910_v20 }
  0x25   : > { %v402_v42 = vsel %vm3818_vm4, 0, %v401_v41  ;;  %v411_v44 = vsel %vm3818_vm4, 0, %v410_v43  ;;  %v392_v45 = vld [vmem:[#allocation2] sm:$0x3]  ;;  %v500_v46 = vld [vmem:[#allocation2 + $0x48] sm:$0x3]  ;;  %3412 = vmatprep.subr.bf16.mxu0 %v3720_v4 }
  0x26   : > { %403 = vst [vmem:[#allocation2 + $0x6] sm:$0x3] %v402_v42  ;;  %412 = vst [vmem:[#allocation2 + $0xc] sm:$0x3] %v411_v44  ;;  %v503_v47 = vld [vmem:[#allocation2 + $0x4a] sm:$0x3] }
  0x27   : > { %v509_v48 = vld [vmem:[#allocation2 + $0x4e] sm:$0x3]  ;;  %v501_v49 = vsel %vm3818_vm4, 0, %v500_v46  ;;  %v504_v50 = vsel %vm3818_vm4, 0, %v503_v47  ;;  %v512_v52 = vld [vmem:[#allocation2 + $0x50] sm:$0x3] }
  0x28   : > { %3379 = vmatmul.mubr.msk.bf16.gmra.mxu0 %vm279_vm1, %v3648_v7  ;;  %v510_v51 = vsel %vm3818_vm4, 0, %v509_v48  ;;  %v393_v53 = vsel %vm3818_vm4, 0, %v392_v45  ;;  %502 = vst [vmem:[#allocation2 + $0x48] sm:$0x3] %v501_v49  ;;  %505 = vst [vmem:[#allocation2 + $0x4a] sm:$0x3] %v504_v50  ;;  %v540_v49 = vlaneseq }
  0x29   : > { %511 = vst [vmem:[#allocation2 + $0x4e] sm:$0x3] %v510_v51  ;;  %v513_v54 = vsel %vm3818_vm4, 0, %v512_v52  ;;  %v518_v55 = vld [vmem:[#allocation2 + $0x54] sm:$0x3]  ;;  %3402 = vmatprep.mubr.msk.bf16.mxu0 %vm3721_vm5, %v3720_v4  ;;  %vm825_vm1 = vcmask 130048  }
  0x2a   : > { %v521_v56 = vld [vmem:[#allocation2 + $0x56] sm:$0x3]  ;;  %394 = vst [vmem:[#allocation2] sm:$0x3] %v393_v53  ;;  %514 = vst [vmem:[#allocation2 + $0x50] sm:$0x3] %v513_v54 }
  0x2b   : > { %v519_v57 = vsel %vm3818_vm4, 0, %v518_v55  ;;  %v522_v58 = vsel %vm3818_vm4, 0, %v521_v56  ;;  %v527_v59 = vld [vmem:[#allocation2 + $0x5a] sm:$0x3]  ;;  %v530_v60 = vld [vmem:[#allocation2 + $0x5c] sm:$0x3] }
  0x2c   : > { %520 = vst [vmem:[#allocation2 + $0x54] sm:$0x3] %v519_v57  ;;  %523 = vst [vmem:[#allocation2 + $0x56] sm:$0x3] %v522_v58  ;;  %v528_v61 = vsel %vm3818_vm4, 0, %v527_v59  ;;  %v531_v62 = vsel %vm3818_vm4, 0, %v530_v60 }
  0x2d   : > { %v464_v63 = vld [vmem:[#allocation2 + $0x30] sm:$0x3]  ;;  %v467_v0 = vld [vmem:[#allocation2 + $0x32] sm:$0x3]  ;;  %529 = vst [vmem:[#allocation2 + $0x5a] sm:$0x3] %v528_v61 }
  0x2e   : > { %532 = vst [vmem:[#allocation2 + $0x5c] sm:$0x3] %v531_v62  ;;  %v465_v1 = vsel %vm3818_vm4, 0, %v464_v63  ;;  %v468_v2 = vsel %vm3818_vm4, 0, %v467_v0  ;;  %v419_v5 = vld [vmem:[#allocation2 + $0x12] sm:$0x3] }
  0x2f   : > { %466 = vst [vmem:[#allocation2 + $0x30] sm:$0x3] %v465_v1  ;;  %469 = vst [vmem:[#allocation2 + $0x32] sm:$0x3] %v468_v2  ;;  %v420_v6 = vsel %vm3818_vm4, 0, %v419_v5  ;;  %v3945_v55 = vshrl.u32 %v540_v49, 7 }
  0x30   : > { %v482_v7 = vld [vmem:[#allocation2 + $0x3c] sm:$0x3]  ;;  %v485_v9 = vld [vmem:[#allocation2 + $0x3e] sm:$0x3]  ;;  %421 = vst [vmem:[#allocation2 + $0x12] sm:$0x3] %v420_v6 }
  0x31   : > { %v483_v10 = vsel %vm3818_vm4, 0, %v482_v7  ;;  %v486_v11 = vsel %vm3818_vm4, 0, %v485_v9  ;;  %v473_v12 = vld [vmem:[#allocation2 + $0x36] sm:$0x3]  ;;  %v476_v13 = vld [vmem:[#allocation2 + $0x38] sm:$0x3] }
  0x32   : > { %484 = vst [vmem:[#allocation2 + $0x3c] sm:$0x3] %v483_v10  ;;  %487 = vst [vmem:[#allocation2 + $0x3e] sm:$0x3] %v486_v11  ;;  %v491_v14 = vld [vmem:[#allocation2 + $0x42] sm:$0x3] }
  0x33   : > { %v474_v15 = vsel %vm3818_vm4, 0, %v473_v12  ;;  %v477_v16 = vsel %vm3818_vm4, 0, %v476_v13  ;;  %v492_v17 = vsel %vm3818_vm4, 0, %v491_v14  ;;  %v494_v18 = vld [vmem:[#allocation2 + $0x44] sm:$0x3]  ;;  %s3658_s15 = scalar_lea.vmem %s3109_s10, 64 }
  0x34   : > { %475 = vst [vmem:[#allocation2 + $0x36] sm:$0x3] %v474_v15  ;;  %478 = vst [vmem:[#allocation2 + $0x38] sm:$0x3] %v477_v16  ;;  %v495_v19 = vsel %vm3818_vm4, 0, %v494_v18  ;;  %p3659_p11 = scmp.ne.s32.totalorder %s3109_s10, %s3658_s15  ;;  %s3664_s17 = scalar_lea.vmem %s3663_s16, 128 }
  0x35   : > { %493 = vst [vmem:[#allocation2 + $0x42] sm:$0x3] %v492_v17  ;;  %496 = vst [vmem:[#allocation2 + $0x44] sm:$0x3] %v495_v19  ;;  %v434_v21 = vld [vmem:[#allocation2 + $0x1c] sm:$0x3]  ;;  %p3666_p1 = scmp.lt.s32.totalorder %s3664_s17, %s3658_s15 }
  0x36   : > { %v443_v22 = vld [vmem:[#allocation2 + $0x22] sm:$0x3]  ;;  %v452_v23 = vld [vmem:[#allocation2 + $0x28] sm:$0x3]  ;;  %v435_v24 = vsel %vm3818_vm4, 0, %v434_v21  ;;  %p3660_p12 = pnand %p3659_p11, %p3793_p5 }
  0x37   : > { %v444_v25 = vsel %vm3818_vm4, 0, %v443_v22  ;;  %v453_v26 = vsel %vm3818_vm4, 0, %v452_v23  ;;  %v461_v27 = vld [vmem:[#allocation2 + $0x2e] sm:$0x3]  ;;  %436 = vst [vmem:[#allocation2 + $0x1c] sm:$0x3] %v435_v24  ;;  %p3667_p2 = por %p3666_p1, %p3665_p0 }
  0x38   : > { %445 = vst [vmem:[#allocation2 + $0x22] sm:$0x3] %v444_v25  ;;  %454 = vst [vmem:[#allocation2 + $0x28] sm:$0x3] %v453_v26  ;;  %v462_v28 = vsel %vm3818_vm4, 0, %v461_v27  ;;  %p3661_p13 = pneg %p3660_p12 }
  0x39   : > { %v470_v29 = vld [vmem:[#allocation2 + $0x34] sm:$0x3]  ;;  %v479_v30 = vld [vmem:[#allocation2 + $0x3a] sm:$0x3]  ;;  %463 = vst [vmem:[#allocation2 + $0x2e] sm:$0x3] %v462_v28 }
  0x3a   : > { %v471_v31 = vsel %vm3818_vm4, 0, %v470_v29  ;;  %v480_v32 = vsel %vm3818_vm4, 0, %v479_v30  ;;  %v488_v33 = vld [vmem:[#allocation2 + $0x40] sm:$0x3]  ;;  %v497_v34 = vld [vmem:[#allocation2 + $0x46] sm:$0x3]  ;;  %p3668_p3 = pnand %p3667_p2, %p3661_p13 }
  0x3b   : > { %472 = vst [vmem:[#allocation2 + $0x34] sm:$0x3] %v471_v31  ;;  %481 = vst [vmem:[#allocation2 + $0x3a] sm:$0x3] %v480_v32  ;;  %v489_v35 = vsel %vm3818_vm4, 0, %v488_v33  ;;  %v498_v36 = vsel %vm3818_vm4, 0, %v497_v34 }
  0x3c   : > { %v506_v37 = vld [vmem:[#allocation2 + $0x4c] sm:$0x3]  ;;  %v515_v38 = vld [vmem:[#allocation2 + $0x52] sm:$0x3]  ;;  %490 = vst [vmem:[#allocation2 + $0x40] sm:$0x3] %v489_v35 }
  0x3d   : > { %499 = vst [vmem:[#allocation2 + $0x46] sm:$0x3] %v498_v36  ;;  %v507_v39 = vsel %vm3818_vm4, 0, %v506_v37  ;;  %v516_v40 = vsel %vm3818_vm4, 0, %v515_v38  ;;  %v524_v41 = vld [vmem:[#allocation2 + $0x58] sm:$0x3] }
  0x3e   : > { %v533_v42 = vld [vmem:[#allocation2 + $0x5e] sm:$0x3]  ;;  %508 = vst [vmem:[#allocation2 + $0x4c] sm:$0x3] %v507_v39  ;;  %517 = vst [vmem:[#allocation2 + $0x52] sm:$0x3] %v516_v40 }
  0x3f   : > { %v525_v43 = vsel %vm3818_vm4, 0, %v524_v41  ;;  %v534_v44 = vsel %vm3818_vm4, 0, %v533_v42  ;;  %v3941_v45 = vld [vmem:[%s4402_s2] ss:$0 sm:$0xff]  ;;  %v3722_v47 = vmov 1983009808  }
  0x40   : > { %526 = vst [vmem:[#allocation2 + $0x58] sm:$0x3] %v525_v43  ;;  %535 = vst [vmem:[#allocation2 + $0x5e] sm:$0x3] %v534_v44  ;;  %v538_v48 = vunpack.c.l.s4 %v3722_v47  ;;  %vm553_vm9 = vsmask.f32 1282 }
  0x41   : > { %v3723_v17 = vmov 1966171168   ;;  %vm3972_vm14 = vmand %vm389_vm2, %vm553_vm9  ;;  %v619_v36 = vld [vmem:[#allocation2 + $0x18] sm:$0x3]  ;;  %v628_v47 = vld [vmem:[#allocation2 + $0x1a] sm:$0x3] }
  0x42   : > { %v539_v8 = vunpack.c.0.s8 %v538_v48  ;;  %v3958_v18 = vunpack.c.l.s4 %v3723_v17  ;;  %vm1570_vm2 = vsmask.f32 256  ;;  %vm1571_vm3 = vsmask.f32 1284 }
  0x43   : > { %vm1572_vm4 = vmor %vm1570_vm2, %vm1571_vm3 }
  0x44   : > { %v3950_v62 = vsub.s32 %v539_v8, %v3945_v55 }
  0xe0   : > { %v3376_v46 = vpop.f32.mrf.mxu0 }
  0xe1   : > { %v339_v50 = vadd.f32 %v3376_v46, %v3941_v45 }
  0xe2   : > { %v330_v51 = vpop.f32.mrf.mxu0 }
  0xe3   : > { %v331_v52 = vadd.f32 %v3941_v45, %v330_v51  ;;  %v371_v53 = vmul.f32 0.2, %v339_v50  ;;  %vm363_vm6 = vcmp.gt.f32.partialorder %v339_v50, 0.0 }
  0xe4   : > { %v3377_v54 = vpop.f32.mrf.mxu0 }
  0xe5   : > { %v342_v56 = vadd.f32 %v3377_v54, %v3941_v45  ;;  %v369_v57 = vmul.f32 0.2, %v331_v52  ;;  %vm361_vm7 = vcmp.gt.f32.partialorder %v331_v52, 0.0  ;;  %v379_v61 = vsel %vm363_vm6, %v339_v50, %v371_v53  ;;  %v555_v54 = vld [vmem:[#allocation2 + $0x2] sm:$0x3] }
  0xe6   : > { %v333_v58 = vpop.f32.mrf.mxu0  ;;  %vm1573_vm6 = vsmask.f32 2312 }
  0xe7   : > { %vm364_vm8 = vcmp.gt.f32.partialorder %v342_v56, 0.0  ;;  %v372_v59 = vmul.f32 0.2, %v342_v56  ;;  %v334_v60 = vadd.f32 %v3941_v45, %v333_v58  ;;  %v377_v5 = vsel %vm361_vm7, %v331_v52, %v369_v57  ;;  %vm1574_vm7 = vmor %vm1572_vm4, %vm1573_vm6 }
  0xe8   : > { %v3380_v63 = vpop.f32.mrf.mxu0 }
  0xe9   : > { %v380_v0 = vsel %vm364_vm8, %v342_v56, %v372_v59  ;;  %vm362_vm11 = vcmp.gt.f32.partialorder %v334_v60, 0.0  ;;  %v370_v1 = vmul.f32 0.2, %v334_v60  ;;  %v355_v2 = vadd.f32 %v3380_v63, %v3941_v45  ;;  %v564_v63 = vld [vmem:[#allocation2 + $0x4] sm:$0x3] }
  0xea   : > { %v386_v6 = vpack.c.bf16 %v380_v0, %v379_v61  ;;  %v3191_v7 = vpack.c.bf16 %v380_v0, %v380_v0  ;;  %v346_v9 = vpop.f32.mrf.mxu0  ;;  %v807_v61 = vunpack.c.0.s8 %v3958_v18  ;;  %vm1575_vm8 = vsmask.f32 3340 }
  0xeb   : > { %v378_v10 = vsel %vm362_vm11, %v334_v60, %v370_v1  ;;  %vm367_vm12 = vcmp.gt.f32.partialorder %v355_v2, 0.0  ;;  %v375_v11 = vmul.f32 0.2, %v355_v2  ;;  %v3954_v12 = vadd.f32 %v3941_v45, %v346_v9  ;;  %v797_v9 = vld [vmem:[#allocation2 + $0x6] sm:$0x1]  ;;  %vm1576_vm9 = vmor %vm1574_vm7, %vm1575_vm8 }
  0xec   : > { %v609_v13 = vrot.slane %v386_v6, %v3950_v62  ;;  %v647_v14 = vrot.slane %v3191_v7, %v3950_v62  ;;  %v385_v15 = vpack.c.bf16 %v378_v10, %v377_v5  ;;  %v3187_v16 = vpack.c.bf16 %v378_v10, %v378_v10  ;;  %v3381_v26 = vpop.f32.mrf.mxu0 }
  0xed   : > { %v3960_v19 = vsel %vm367_vm12, %v355_v2, %v375_v11  ;;  %vm365_vm13 = vcmp.gt.f32.partialorder %v3954_v12, 0.0  ;;  %v373_v21 = vmul.f32 0.2, %v3954_v12  ;;  %v358_v30 = vadd.f32 %v3381_v26, %v3941_v45 }
  0xee   : > { %v611_v22 = vshrl.u32 %v609_v13, 16  ;;  %v614_v23 = vshll.u32 %v609_v13, 16  ;;  %v631_v24 = vcombine.high %v609_v13, %v609_v13  ;;  %650 = vst.msk [vmem:[#allocation2 + $0x24] sm:$0x1] %vm570_vm10, %v647_v14  ;;  %v3192_v25 = vrot.slane %v647_v14, 9  ;;  %v349_v46 = vpop.f32.mrf.mxu0 }
  0xef   : > { %v656_v27 = vcombine.high %v647_v14, %v647_v14  ;;  %v543_v28 = vrot.slane %v385_v15, %v3950_v62  ;;  %v584_v29 = vrot.slane %v3187_v16, %v3950_v62  ;;  %vm368_vm15 = vcmp.gt.f32.partialorder %v358_v30, 0.0 }
  0xf0   : > { %v613_v31 = vrot.slane %v611_v22, 7  ;;  %v622_v32 = vrot.slane %v611_v22, 6  ;;  %v623_v33 = vrot.slane %v614_v23, 7  ;;  %634 = vst.msk [vmem:[#allocation2 + $0x1e] sm:$0x1] %vm570_vm10, %v631_v24  ;;  %v3190_v34 = vrot.slane %v631_v24, 9 }
  0xf1   : > { %655 = vst.msk [vmem:[#allocation2 + $0x26] sm:$0x1] %vm570_vm10, %v3192_v25  ;;  %659 = vst.msk [vmem:[#allocation2 + $0x2a] sm:$0x1] %vm570_vm10, %v656_v27  ;;  %v3193_v37 = vrot.slane %v656_v27, 9  ;;  %v545_v38 = vshrl.u32 %v543_v28, 16  ;;  %v567_v40 = vcombine.high %v543_v28, %v543_v28  ;;  %v593_v44 = vcombine.high %v584_v29, %v584_v29 }
  0xf2   : > { %v548_v39 = vshll.u32 %v543_v28, 16  ;;  %587 = vst.msk [vmem:[#allocation2 + $0xe] sm:$0x1] %vm570_vm10, %v584_v29  ;;  %v616_v41 = vor.u32 %v614_v23, %v613_v31  ;;  %v624_v42 = vor.u32 %v623_v33, %v622_v32  ;;  %639 = vst.msk [vmem:[#allocation2 + $0x20] sm:$0x1] %vm570_vm10, %v3190_v34  ;;  %v3188_v43 = vrot.slane %v584_v29, 9 }
  0xf3   : > { %664 = vst.msk [vmem:[#allocation2 + $0x2c] sm:$0x1] %vm570_vm10, %v3193_v37  ;;  %v547_v48 = vrot.slane %v545_v38, 7  ;;  %v558_v49 = vrot.slane %v545_v38, 6  ;;  %571 = vst.msk [vmem:[#allocation2 + $0x8] sm:$0x1] %vm570_vm10, %v567_v40  ;;  %v350_v59 = vadd.f32 %v3941_v45, %v349_v46  ;;  %v381_v45 = vsel %vm365_vm13, %v3954_v12, %v373_v21 }
  0xf4   : > { %v559_v50 = vrot.slane %v548_v39, 7  ;;  %v3186_v51 = vrot.slane %v567_v40, 9  ;;  %v620_v52 = vsel %vm3972_vm14, %v616_v41, %v619_v36  ;;  %v625_v53 = vrot.slane %v624_v42, 2  ;;  %592 = vst.msk [vmem:[#allocation2 + $0x10] sm:$0x1] %vm570_vm10, %v3188_v43 }
  0xf5   : > { %596 = vst.msk [vmem:[#allocation2 + $0x14] sm:$0x1] %vm570_vm10, %v593_v44  ;;  %v3189_v8 = vrot.slane %v593_v44, 9  ;;  %621 = vst [vmem:[#allocation2 + $0x18] sm:$0x3] %v620_v52  ;;  %v550_v56 = vor.u32 %v548_v39, %v547_v48  ;;  %vm366_vm0 = vcmp.gt.f32.partialorder %v350_v59, 0.0  ;;  %v4000_v11 = vsub.s32 %v807_v61, %v3945_v55 }
  0xf6   : > { %v560_v57 = vor.u32 %v559_v50, %v558_v49  ;;  %576 = vst.msk [vmem:[#allocation2 + $0xa] sm:$0x1] %vm570_vm10, %v3186_v51  ;;  %v376_v58 = vmul.f32 0.2, %v358_v30  ;;  %v629_v60 = vsel %vm3972_vm14, %v625_v53, %v628_v47  ;;  %v374_v7 = vmul.f32 0.2, %v350_v59 }
  0xf7   : > { %601 = vst.msk [vmem:[#allocation2 + $0x16] sm:$0x1] %vm570_vm10, %v3189_v8  ;;  %630 = vst [vmem:[#allocation2 + $0x1a] sm:$0x3] %v629_v60  ;;  %v556_v0 = vsel %vm3972_vm14, %v550_v56, %v555_v54  ;;  %v745_v28 = vld [vmem:[#allocation2 + $0x48] sm:$0x3] }
  0xf8   : > { %v561_v1 = vrot.slane %v560_v57, 2  ;;  %v384_v2 = vsel %vm368_vm15, %v358_v30, %v376_v58  ;;  %557 = vst [vmem:[#allocation2 + $0x2] sm:$0x3] %v556_v0  ;;  %v382_v15 = vsel %vm366_vm0, %v350_v59, %v374_v7  ;;  %v754_v32 = vld [vmem:[#allocation2 + $0x4a] sm:$0x3]  ;;  %v4018_v49 = vld [vmem:[%s4403_s3] sm:$0xff]  }
  0xf9   : > { %v388_v5 = vpack.c.bf16 %v384_v2, %v3960_v19  ;;  %v3199_v6 = vpack.c.bf16 %v384_v2, %v384_v2  ;;  %v387_v17 = vpack.c.bf16 %v382_v15, %v381_v45  ;;  %v3195_v12 = vpack.c.bf16 %v382_v15, %v382_v15  ;;  %v682_v52 = vld [vmem:[#allocation2 + $0x30] sm:$0x3]  ;;  %v691_v61 = vld [vmem:[#allocation2 + $0x32] sm:$0x3] }
  0xfa   : > { %v565_v10 = vsel %vm3972_vm14, %v561_v1, %v564_v63  ;;  %v798_v16 = vld [vmem:[#allocation2 + $0x8] sm:$0x1]  ;;  %v1153_v63 = vld [vmem:[#allocation2 + $0x26] sm:$0x1]  ;;  %v4052_v15 = vld [vmem:[%s4403_s3 + $0x10] sm:$0xff]  }
  0xfb   : > { %566 = vst [vmem:[#allocation2 + $0x4] sm:$0x3] %v565_v10  ;;  %v735_v13 = vrot.slane %v388_v5, %v3950_v62  ;;  %v773_v14 = vrot.slane %v3199_v6, %v3950_v62  ;;  %v804_v18 = vcombine.low %v797_v9, %v798_v16  ;;  %v672_v24 = vrot.slane %v387_v17, %v3950_v62  ;;  %v4041_v5 = vld [vmem:[%s4403_s3 + $0x28] sm:$0xff]   ;;  %v1152_v6 = vld [vmem:[#allocation2 + $0x24] sm:$0x1] }
  0xfc   : > { %v710_v25 = vrot.slane %v3195_v12, %v3950_v62  ;;  %v792_v62 = vld [vmem:[#allocation2] sm:$0x1]  ;;  %v1008_v8 = vld [vmem:[#allocation2 + $0x18] sm:$0x1]  ;;  %v1159_v10 = vcombine.low %v1152_v6, %v1153_v63  ;;  %vm1579_vm12 = vsmask.f32 5396 }
  0xfd   : > { %v737_v19 = vshrl.u32 %v735_v13, 16  ;;  %v740_v21 = vshll.u32 %v735_v13, 16  ;;  %v757_v22 = vcombine.high %v735_v13, %v735_v13  ;;  %776 = vst.msk [vmem:[#allocation2 + $0x54] sm:$0x1] %vm570_vm10, %v773_v14  ;;  %v3200_v23 = vrot.slane %v773_v14, 9  ;;  %v4145_v6 = vld [vmem:[%s4403_s3 + $0x40] sm:$0xff]  }
  0xfe   : > { %v782_v55 = vcombine.high %v773_v14, %v773_v14  ;;  %v811_v26 = vrot.slane %v804_v18, %v4000_v11  ;;  %v674_v34 = vshrl.u32 %v672_v24, 16  ;;  %v677_v36 = vshll.u32 %v672_v24, 16  ;;  %713 = vst.msk [vmem:[#allocation2 + $0x3c] sm:$0x1] %vm570_vm10, %v710_v25  ;;  %v1009_v42 = vld [vmem:[#allocation2 + $0x1a] sm:$0x1] }
  0xff   : > { %v739_v27 = vrot.slane %v737_v19, 7  ;;  %v748_v29 = vrot.slane %v737_v19, 6  ;;  %v749_v30 = vrot.slane %v740_v21, 7  ;;  %760 = vst.msk [vmem:[#allocation2 + $0x4e] sm:$0x1] %vm570_vm10, %v757_v22  ;;  %v3198_v31 = vrot.slane %v757_v22, 9 }
 0x100   : > { %781 = vst.msk [vmem:[#allocation2 + $0x56] sm:$0x1] %vm570_vm10, %v3200_v23  ;;  %785 = vst.msk [vmem:[#allocation2 + $0x5a] sm:$0x1] %vm570_vm10, %v782_v55  ;;  %v3201_v33 = vrot.slane %v782_v55, 9  ;;  %v694_v37 = vcombine.high %v672_v24, %v672_v24  ;;  %v3196_v40 = vrot.slane %v710_v25, 9  ;;  %v719_v41 = vcombine.high %v710_v25, %v710_v25 }
 0x101   : > { %v742_v38 = vor.u32 %v740_v21, %v739_v27  ;;  %v750_v39 = vor.u32 %v749_v30, %v748_v29  ;;  %765 = vst.msk [vmem:[#allocation2 + $0x50] sm:$0x1] %vm570_vm10, %v3198_v31  ;;  %v793_v43 = vld [vmem:[#allocation2 + $0x2] sm:$0x1]  ;;  %v676_v44 = vrot.slane %v674_v34, 7  ;;  %v685_v46 = vrot.slane %v674_v34, 6 }
 0x102   : > { %790 = vst.msk [vmem:[#allocation2 + $0x5c] sm:$0x1] %vm570_vm10, %v3201_v33  ;;  %v686_v47 = vrot.slane %v677_v36, 7  ;;  %697 = vst.msk [vmem:[#allocation2 + $0x36] sm:$0x1] %vm570_vm10, %v694_v37  ;;  %v3194_v48 = vrot.slane %v694_v37, 9  ;;  %v818_v54 = vrot.slane %v811_v26, %v4000_v11  ;;  %v1015_v58 = vcombine.low %v1008_v8, %v1009_v42 }
 0x103   : > { %v746_v50 = vsel %vm3972_vm14, %v742_v38, %v745_v28  ;;  %v751_v51 = vrot.slane %v750_v39, 2  ;;  %718 = vst.msk [vmem:[#allocation2 + $0x3e] sm:$0x1] %vm570_vm10, %v3196_v40  ;;  %722 = vst.msk [vmem:[#allocation2 + $0x42] sm:$0x1] %vm570_vm10, %v719_v41  ;;  %v3197_v53 = vrot.slane %v719_v41, 9  ;;  %v679_v56 = vor.u32 %v677_v36, %v676_v44 }
 0x104   : > { %747 = vst [vmem:[#allocation2 + $0x48] sm:$0x3] %v746_v50  ;;  %v687_v57 = vor.u32 %v686_v47, %v685_v46  ;;  %702 = vst.msk [vmem:[#allocation2 + $0x38] sm:$0x1] %vm570_vm10, %v3194_v48  ;;  %v871_v59 = vcombine.low %v792_v62, %v793_v43  ;;  %3385 = vmatmul.mubr.msk.bf16.vlgmr.msra.gmra.mxu1 %vm825_vm1, %v818_v54  ;;  %v1022_v2 = vrot.slane %v1015_v58, %v4000_v11  ;;  %v936_v13 = vld [vmem:[#allocation2 + $0xc] sm:$0x1] }
 0x105   : > { %v755_v60 = vsel %vm3972_vm14, %v751_v51, %v754_v32  ;;  %727 = vst.msk [vmem:[#allocation2 + $0x44] sm:$0x1] %vm570_vm10, %v3197_v53  ;;  %v683_v0 = vsel %vm3972_vm14, %v679_v56, %v682_v52  ;;  %3389 = vmatpush3.bf16.msra.mxu1 %v4018_v49  ;;  %3390 = vmatprep.mubr.msk.bf16.mxu1 %vm3721_vm5, %v3720_v4  ;;  %v937_v14 = vld [vmem:[#allocation2 + $0xe] sm:$0x1]  ;;  %vm1577_vm10 = vsmask.f32 4368 }
 0x106   : > { %756 = vst [vmem:[#allocation2 + $0x4a] sm:$0x3] %v755_v60  ;;  %v688_v1 = vrot.slane %v687_v57, 2  ;;  %684 = vst [vmem:[#allocation2 + $0x30] sm:$0x3] %v683_v0  ;;  %3394 = vmatprep.subr.bf16.mxu1 %v3720_v4  ;;  %v878_v45 = vrot.slane %v871_v59, %v4000_v11  ;;  %v1029_v9 = vrot.slane %v1022_v2, %v4000_v11  ;;  %v4069_v21 = vld [vmem:[%s4403_s3 + $0x38] sm:$0xff]  }
 0x107   : > { %v943_v16 = vcombine.low %v936_v13, %v937_v14  ;;  %v1166_v17 = vrot.slane %v1159_v10, %v4000_v11  ;;  %v1081_v22 = vld [vmem:[#allocation2 + $0x20] sm:$0x1]  ;;  %v3240_v24 = vld.sshfl [vmem:[#allocation2 + $0x2] sm:$0x11 pattern:$0x75316420]  ;;  %vm1578_vm11 = vmor %vm1576_vm9, %vm1577_vm10 }
 0x108   : > { %v692_v7 = vsel %vm3972_vm14, %v688_v1, %v691_v61  ;;  %3403 = vmatmul.mubr.msk.bf16.vlgmr.msra.gmra.mxu0 %vm825_vm1, %v1029_v9  ;;  %v885_v35 = vrot.slane %v878_v45, %v4000_v11  ;;  %v1080_v25 = vld [vmem:[#allocation2 + $0x1e] sm:$0x1]  ;;  %v4079_v26 = vld [vmem:[%s4403_s3 + $0x20] sm:$0xff]   ;;  %v1569_v30 = vcombine.high %v3240_v24, %v3240_v24  ;;  %vm1580_vm13 = vmor %vm1578_vm11, %vm1579_vm12  ;;  %vm1581_vm14 = vsmask.f32 6424 }
 0x109   : > { %693 = vst [vmem:[#allocation2 + $0x32] sm:$0x3] %v692_v7  ;;  %3413 = vmatpush3.bf16.msra.mxu0 %v4041_v5  ;;  %3414 = vmatprep.mubr.msk.bf16.mxu0 %vm3721_vm5, %v3720_v4  ;;  %v1296_v12 = vld [vmem:[#allocation2 + $0x36] sm:$0x1]  ;;  %v950_v19 = vrot.slane %v943_v16, %v4000_v11  ;;  %v4072_v23 = vrot.slane %v1166_v17, %v4000_v11  ;;  %v1448_v33 = vld [vmem:[#allocation2 + $0x12] sm:$0x1]  ;;  %vm4096_vm15 = vmor %vm1580_vm13, %vm1581_vm14 }
 0x10a   : > { %3424 = vmatprep.subr.bf16.mxu0 %v3720_v4  ;;  %v1087_v27 = vcombine.low %v1080_v25, %v1081_v22  ;;  %v3239_v28 = vld.sshfl [vmem:[#allocation2] sm:$0x11 pattern:$0x75316420]  ;;  %v1449_v34 = vld [vmem:[#allocation2 + $0x14] sm:$0x1] }
 0x10b   : > { %v1297_v18 = vld [vmem:[#allocation2 + $0x38] sm:$0x1]  ;;  %v4082_v29 = vrot.slane %v950_v19, %v4000_v11  ;;  %v3280_v32 = vld.sshfl [vmem:[#allocation2 + $0x4] sm:$0x11 pattern:$0x75316420]  ;;  %v1561_v36 = vcombine.high %v3239_v28, %v3239_v28  ;;  %v1452_v41 = vcombine.low %v1448_v33, %v1449_v34 }
 0x10c   : > { %3391 = vmatmul.mubr.msk.bf16.vlgmr.msra.gmra.mxu1 %vm825_vm1, %v885_v35  ;;  %v1303_v55 = vcombine.low %v1296_v12, %v1297_v18  ;;  %v1094_v37 = vrot.slane %v1087_v27, %v4000_v11  ;;  %vm1583_vm0 = vsmask.f32 7452  ;;  %v1600_v38 = vshll.u32 %v1569_v30, 16  ;;  %v4109_v52 = vld [vmem:[%s4403_s3 + $0x30] sm:$0xff]   ;;  %v1368_v1 = vld [vmem:[#allocation2 + $0x3c] sm:$0x1] }
 0x10d   : > { %3395 = vmatpush3.bf16.msra.mxu1 %v4052_v15  ;;  %3396 = vmatprep.mubr.msk.bf16.mxu1 %vm3721_vm5, %v3720_v4  ;;  %v3012_v39 = vcombine.high %v3280_v32, %v3280_v32  ;;  %v1224_v42 = vld [vmem:[#allocation2 + $0x30] sm:$0x1]  ;;  %v1586_v44 = vshrl.u32 %v3239_v28, 16  ;;  %v1591_v46 = vshll.u32 %v1561_v36, 16  ;;  %v1595_v47 = vshrl.u32 %v3240_v24, 16  ;;  %vm4114_vm2 = vmor %vm4096_vm15, %vm1583_vm0 }
 0x10e   : > { %3406 = vmatprep.subr.bf16.mxu1 %v3720_v4  ;;  %v1310_v31 = vrot.slane %v1303_v55, %v4000_v11  ;;  %v3023_v48 = vshrl.u32 %v3280_v32, 16  ;;  %v1101_v51 = vrot.slane %v1094_v37, %v4000_v11  ;;  %v1459_v57 = vrot.slane %v1452_v41, %v4000_v11  ;;  %v1369_v2 = vld [vmem:[#allocation2 + $0x3e] sm:$0x1]  ;;  %v1704_v13 = vld [vmem:[#allocation2 + $0x2c] sm:$0x1] }
 0x10f   : > { %v3028_v50 = vshll.u32 %v3012_v39, 16  ;;  %v1602_v8 = vsel %vm4114_vm2, %v1595_v47, %v1600_v38  ;;  %v1593_v59 = vsel %vm4114_vm2, %v1586_v44, %v1591_v46  ;;  %v1375_v9 = vcombine.low %v1368_v1, %v1369_v2  ;;  %v1703_v35 = vld [vmem:[#allocation2 + $0x2a] sm:$0x1]  ;;  %v2314_v1 = vld [vmem:[#allocation2 + $0x56] sm:$0x1] }
 0x110   : > { %3415 = vmatmul.mubr.msk.bf16.vlgmr.msra.gmra.mxu0 %vm825_vm1, %v4072_v23  ;;  %v4101_v40 = vrot.slane %v1310_v31, %v4000_v11  ;;  %v1225_v43 = vld [vmem:[#allocation2 + $0x32] sm:$0x1]  ;;  %v1466_v63 = vrot.slane %v1459_v57, %v4000_v11  ;;  %v1603_v0 = vcombine.low %v1593_v59, %v1602_v8  ;;  %v1707_v17 = vcombine.low %v1703_v35, %v1704_v13  ;;  %v3253_v12 = vld.sshfl [vmem:[#allocation2 + $0x30] sm:$0x11 pattern:$0x75316420] }
 0x111   : > { %3425 = vmatpush3.bf16.msra.mxu0 %v4069_v21  ;;  %3426 = vmatprep.mubr.msk.bf16.mxu0 %vm3721_vm5, %v3720_v4  ;;  %v1231_v54 = vcombine.low %v1224_v42, %v1225_v43  ;;  %v3030_v56 = vsel %vm4114_vm2, %v3023_v48, %v3028_v50  ;;  %v1382_v14 = vrot.slane %v1375_v9, %v4000_v11  ;;  %v3254_v18 = vld.sshfl [vmem:[#allocation2 + $0x32] sm:$0x11 pattern:$0x75316420]  ;;  %v1988_v31 = vshrl.u32 %v3253_v12, 16 }
 0x112   : > { %3436 = vmatprep.subr.bf16.mxu0 %v3720_v4  ;;  %v3031_v58 = vcombine.low %v1602_v8, %v3030_v56  ;;  %v1610_v10 = vrot.slane %v1603_v0, %v4000_v11  ;;  %v1714_v22 = vrot.slane %v1707_v17, %v4000_v11  ;;  %v1978_v55 = vcombine.high %v3253_v12, %v3253_v12  ;;  %v3247_v25 = vld.sshfl [vmem:[#allocation2 + $0x1a] sm:$0x11 pattern:$0x75316420]  ;;  %v2187_v56 = vld [vmem:[#allocation2 + $0x48] sm:$0x1] }
 0x113   : > { %v1238_v61 = vrot.slane %v1231_v54, %v4000_v11  ;;  %v4165_v19 = vrot.slane %v1382_v14, %v4000_v11  ;;  %v1986_v24 = vcombine.high %v3254_v18, %v3254_v18  ;;  %v3246_v27 = vld.sshfl [vmem:[#allocation2 + $0x18] sm:$0x11 pattern:$0x75316420]  ;;  %v1785_v30 = vcombine.high %v3247_v25, %v3247_v25  ;;  %v1905_v54 = vld [vmem:[#allocation2 + $0x44] sm:$0x1] }
 0x114   : > { %3397 = vmatmul.mubr.msk.bf16.vlgmr.msra.gmra.mxu1 %vm825_vm1, %v4082_v29  ;;  %v4134_v60 = vrot.slane %v3031_v58, %v4000_v11  ;;  %v1617_v16 = vrot.slane %v1610_v10, %v4000_v11  ;;  %v1721_v28 = vrot.slane %v1714_v22, %v4000_v11  ;;  %v1993_v32 = vshll.u32 %v1978_v55, 16  ;;  %v2188_v57 = vld [vmem:[#allocation2 + $0x4a] sm:$0x1]  ;;  %v2313_v0 = vld [vmem:[#allocation2 + $0x54] sm:$0x1] }
 0x115   : > { %3407 = vmatpush3.bf16.msra.mxu1 %v4079_v26  ;;  %3408 = vmatprep.mubr.msk.bf16.mxu1 %vm3721_vm5, %v3720_v4  ;;  %v4148_v7 = vrot.slane %v1238_v61, %v4000_v11  ;;  %v1997_v33 = vshrl.u32 %v3254_v18, 16  ;;  %v2002_v34 = vshll.u32 %v1986_v24, 16  ;;  %v1777_v36 = vcombine.high %v3246_v27, %v3246_v27  ;;  %v2440_v10 = vld [vmem:[#allocation2 + $0xa] sm:$0x1]  ;;  %v2439_v13 = vld [vmem:[#allocation2 + $0x8] sm:$0x1] }
 0x116   : > { %3418 = vmatprep.subr.bf16.mxu1 %v3720_v4  ;;  %v3045_v45 = vrot.slane %v4134_v60, %v4000_v11  ;;  %v1801_v37 = vshll.u32 %v1785_v30, 16  ;;  %v1995_v62 = vsel %vm4114_vm2, %v1988_v31, %v1993_v32  ;;  %v1796_v41 = vshrl.u32 %v3247_v25, 16  ;;  %v2251_v17 = vld [vmem:[#allocation2 + $0x50] sm:$0x1]  ;;  %v2377_v55 = vld [vmem:[#allocation2 + $0x4] sm:$0x1] }
 0x117   : > { %v2004_v38 = vsel %vm4114_vm2, %v1997_v33, %v2002_v34  ;;  %v1792_v39 = vshll.u32 %v1777_v36, 16  ;;  %v1787_v43 = vshrl.u32 %v3246_v27, 16  ;;  %v2191_v59 = vcombine.low %v2187_v56, %v2188_v57  ;;  %v2376_v24 = vld [vmem:[#allocation2 + $0x2] sm:$0x1]  ;;  %v2503_v30 = vld [vmem:[#allocation2 + $0x10] sm:$0x1] }
 0x118   : > { %3427 = vmatmul.mubr.msk.bf16.vlgmr.msra.gmra.mxu0 %vm825_vm1, %v4101_v40  ;;  %v2005_v42 = vcombine.low %v1995_v62, %v2004_v38  ;;  %v2443_v35 = vcombine.low %v2439_v13, %v2440_v10  ;;  %v2380_v27 = vcombine.low %v2376_v24, %v2377_v55  ;;  %v2729_v33 = vld [vmem:[#allocation2 + $0x5a] sm:$0x1]  ;;  %v2730_v34 = vld [vmem:[#allocation2 + $0x5c] sm:$0x1]  ;;  %v2931_v53 = vld [vmem:[#allocation2 + $0x16] sm:$0x1] }
 0x119   : > { %3437 = vmatpush3.bf16.msra.mxu0 %v3883_v3  ;;  %3438 = vmatprep.mubr.msk.bf16.mxu0 %vm3721_vm5, %v3720_v4  ;;  %v1794_v44 = vsel %vm4114_vm2, %v1787_v43, %v1792_v39  ;;  %v3272_v38 = vld.sshfl [vmem:[#allocation2 + $0x48] sm:$0x11 pattern:$0x75316420] }
 0x11a   : > { %3448 = vmatprep.subr.bf16.mxu0 %v3720_v4  ;;  %v2012_v47 = vrot.slane %v2005_v42, %v4000_v11  ;;  %v2450_v12 = vrot.slane %v2443_v35, %v4000_v11  ;;  %v3273_v39 = vld.sshfl [vmem:[#allocation2 + $0x4a] sm:$0x11 pattern:$0x75316420]  ;;  %v2813_v43 = vshrl.u32 %v3272_v38, 16 }
 0x11b   : > { %v2811_v42 = vcombine.high %v3273_v39, %v3273_v39 }
 0x11c   : > { %3409 = vmatmul.mubr.msk.bf16.vlgmr.msra.gmra.mxu1 %vm825_vm1, %v1101_v51  ;;  %v4213_v50 = vrot.slane %v2012_v47, %v4000_v11  ;;  %v1904_v51 = vld [vmem:[#allocation2 + $0x42] sm:$0x1]  ;;  %v2457_v22 = vrot.slane %v2450_v12, %v4000_v11 }
 0x11d   : > { %3419 = vmatpush3.bf16.msra.mxu1 %v4109_v52  ;;  %3420 = vmatprep.mubr.msk.bf16.mxu1 %vm3721_vm5, %v3720_v4 }
 0x11e   : > { %3430 = vmatprep.subr.bf16.mxu1 %v3720_v4 }
 0x120   : > { %3439 = vmatmul.mubr.msk.bf16.vlgmr.msra.gmra.mxu0 %vm825_vm1, %v1466_v63  ;;  %v2198_v63 = vrot.slane %v2191_v59, %v4000_v11 }
 0x121   : > { %3449 = vmatpush3.bf16.msra.mxu0 %v4052_v15  ;;  %3450 = vmatprep.mubr.msk.bf16.mxu0 %vm3721_vm5, %v3720_v4 }
 0x122   : > { %3460 = vmatprep.subr.bf16.mxu0 %v3720_v4  ;;  %v2205_v2 = vrot.slane %v2198_v63, %v4000_v11 }
 0x124   : > { %3421 = vmatmul.mubr.msk.bf16.vlgmr.msra.gmra.mxu1 %vm825_vm1, %v4148_v7 }
 0x125   : > { %3431 = vmatpush3.bf16.msra.mxu1 %v4145_v6  ;;  %3432 = vmatprep.mubr.msk.bf16.mxu1 %vm3721_vm5, %v3720_v4 }
 0x126   : > { %3442 = vmatprep.subr.bf16.mxu1 %v3720_v4 }
 0x128   : > { %3451 = vmatmul.mubr.msk.bf16.vlgmr.msra.gmra.mxu0 %vm825_vm1, %v1617_v16  ;;  %v2250_v16 = vld [vmem:[#allocation2 + $0x4e] sm:$0x1] }
 0x129   : > { %3461 = vmatpush3.bf16.msra.mxu0 %v4079_v26  ;;  %3462 = vmatprep.mubr.msk.bf16.mxu0 %vm3721_vm5, %v3720_v4 }
 0x12a   : > { %3472 = vmatprep.subr.bf16.mxu0 %v3720_v4 }
 0x12c   : > { %3433 = vmatmul.mubr.msk.bf16.vlgmr.msra.gmra.mxu1 %vm825_vm1, %v4165_v19 }
 0x12d   : > { %3443 = vmatpush3.bf16.msra.mxu1 %v4018_v49  ;;  %3444 = vmatprep.mubr.msk.bf16.mxu1 %vm3721_vm5, %v3720_v4 }
 0x12e   : > { %3454 = vmatprep.subr.bf16.mxu1 %v3720_v4 }
 0x130   : > { %3463 = vmatmul.mubr.msk.bf16.vlgmr.msra.gmra.mxu0 %vm825_vm1, %v1721_v28  ;;  %v2387_v28 = vrot.slane %v2380_v27, %v4000_v11 }
 0x131   : > { %3473 = vmatpush3.bf16.msra.mxu0 %v4109_v52  ;;  %3474 = vmatprep.mubr.msk.bf16.mxu0 %vm3721_vm5, %v3720_v4 }
 0x132   : > { %3484 = vmatprep.subr.bf16.mxu0 %v3720_v4  ;;  %v2394_v31 = vrot.slane %v2387_v28, %v4000_v11 }
 0x134   : > { %3445 = vmatmul.mubr.msk.bf16.vlgmr.msra.gmra.mxu1 %vm825_vm1, %v4082_v29  ;;  %v1803_v29 = vsel %vm4114_vm2, %v1796_v41, %v1801_v37  ;;  %v2803_v41 = vcombine.high %v3272_v38, %v3272_v38 }
 0x135   : > { %3455 = vmatpush3.bf16.msra.mxu1 %v3910_v20  ;;  %3456 = vmatprep.mubr.msk.bf16.mxu1 %vm3721_vm5, %v3720_v4  ;;  %v1804_v46 = vcombine.low %v1794_v44, %v1803_v29  ;;  %v2822_v29 = vshrl.u32 %v3273_v39, 16  ;;  %v2827_v44 = vshll.u32 %v2811_v42, 16 }
 0x136   : > { %3466 = vmatprep.subr.bf16.mxu1 %v3720_v4 }
 0x137   : > { %v1811_v48 = vrot.slane %v1804_v46, %v4000_v11  ;;  %v2829_v46 = vsel %vm4114_vm2, %v2822_v29, %v2827_v44 }
 0x138   : > { %3475 = vmatmul.mubr.msk.bf16.vlgmr.msra.gmra.mxu0 %vm825_vm1, %v4165_v19 }
 0x139   : > { %3485 = vmatpush3.bf16.msra.mxu0 %v4145_v6  ;;  %3486 = vmatprep.mubr.msk.bf16.mxu0 %vm3721_vm5, %v3720_v4  ;;  %v1818_v8 = vrot.slane %v1811_v48, %v4000_v11 }
 0x13a   : > { %3496 = vmatprep.subr.bf16.mxu0 %v3720_v4 }
 0x13c   : > { %3457 = vmatmul.mubr.msk.bf16.vlgmr.msra.gmra.mxu1 %vm825_vm1, %v4072_v23  ;;  %v1908_v23 = vcombine.low %v1904_v51, %v1905_v54 }
 0x13d   : > { %3467 = vmatpush3.bf16.msra.mxu1 %v4041_v5  ;;  %3468 = vmatprep.mubr.msk.bf16.mxu1 %vm3721_vm5, %v3720_v4 }
 0x13e   : > { %3478 = vmatprep.subr.bf16.mxu1 %v3720_v4  ;;  %v1915_v58 = vrot.slane %v1908_v23, %v4000_v11 }
 0x140   : > { %3487 = vmatmul.mubr.msk.bf16.vlgmr.msra.gmra.mxu0 %vm825_vm1, %v4213_v50  ;;  %v1922_v61 = vrot.slane %v1915_v58, %v4000_v11 }
 0x141   : > { %3497 = vmatpush3.bf16.msra.mxu0 %v4018_v49  ;;  %3498 = vmatprep.mubr.msk.bf16.mxu0 %vm3721_vm5, %v3720_v4 }
 0x142   : > { %3508 = vmatprep.subr.bf16.mxu0 %v3720_v4 }
 0x144   : > { %3469 = vmatmul.mubr.msk.bf16.vlgmr.msra.gmra.mxu1 %vm825_vm1, %v1818_v8 }
 0x145   : > { %3479 = vmatpush3.bf16.msra.mxu1 %v4069_v21  ;;  %3480 = vmatprep.mubr.msk.bf16.mxu1 %vm3721_vm5, %v3720_v4 }
 0x146   : > { %3490 = vmatprep.subr.bf16.mxu1 %v3720_v4 }
 0x148   : > { %3499 = vmatmul.mubr.msk.bf16.vlgmr.msra.gmra.mxu0 %vm825_vm1, %v4148_v7  ;;  %v2317_v7 = vcombine.low %v2313_v0, %v2314_v1 }
 0x149   : > { %3509 = vmatpush3.bf16.msra.mxu0 %v3910_v20  ;;  %3510 = vmatprep.mubr.msk.bf16.mxu0 %vm3721_vm5, %v3720_v4 }
 0x14a   : > { %3520 = vmatprep.subr.bf16.mxu0 %v3720_v4  ;;  %v2324_v9 = vrot.slane %v2317_v7, %v4000_v11 }
 0x14c   : > { %3481 = vmatmul.mubr.msk.bf16.vlgmr.msra.gmra.mxu1 %vm825_vm1, %v1922_v61  ;;  %v4255_v14 = vrot.slane %v2324_v9, %v4000_v11 }
 0x14d   : > { %3491 = vmatpush3.bf16.msra.mxu1 %v3883_v3  ;;  %3492 = vmatprep.mubr.msk.bf16.mxu1 %vm3721_vm5, %v3720_v4 }
 0x14e   : > { %3502 = vmatprep.subr.bf16.mxu1 %v3720_v4 }
 0x150   : > { %3511 = vmatmul.mubr.msk.bf16.vlgmr.msra.gmra.mxu0 %vm825_vm1, %v2205_v2 }
 0x151   : > { %3521 = vmatpush3.bf16.msra.mxu0 %v4041_v5  ;;  %3522 = vmatprep.mubr.msk.bf16.mxu0 %vm3721_vm5, %v3720_v4 }
 0x152   : > { %3532 = vmatprep.subr.bf16.mxu0 %v3720_v4 }
 0x154   : > { %3493 = vmatmul.mubr.msk.bf16.vlgmr.msra.gmra.mxu1 %vm825_vm1, %v4101_v40  ;;  %v2254_v40 = vcombine.low %v2250_v16, %v2251_v17 }
 0x155   : > { %3503 = vmatpush3.bf16.msra.mxu1 %v4052_v15  ;;  %3504 = vmatprep.mubr.msk.bf16.mxu1 %vm3721_vm5, %v3720_v4 }
 0x156   : > { %3514 = vmatprep.subr.bf16.mxu1 %v3720_v4  ;;  %v2261_v18 = vrot.slane %v2254_v40, %v4000_v11 }
 0x158   : > { %3523 = vmatmul.mubr.msk.bf16.vlgmr.msra.gmra.mxu0 %vm825_vm1, %v4255_v14  ;;  %v2268_v25 = vrot.slane %v2261_v18, %v4000_v11 }
 0x159   : > { %3533 = vmatpush3.bf16.msra.mxu0 %v4069_v21  ;;  %3534 = vmatprep.mubr.msk.bf16.mxu0 %vm3721_vm5, %v3720_v4 }
 0x15a   : > { %3544 = vmatprep.subr.bf16.mxu0 %v3720_v4 }
 0x15c   : > { %3505 = vmatmul.mubr.msk.bf16.vlgmr.msra.gmra.mxu1 %vm825_vm1, %v4165_v19 }
 0x15d   : > { %3515 = vmatpush3.bf16.msra.mxu1 %v4079_v26  ;;  %3516 = vmatprep.mubr.msk.bf16.mxu1 %vm3721_vm5, %v3720_v4 }
 0x15e   : > { %3526 = vmatprep.subr.bf16.mxu1 %v3720_v4 }
 0x160   : > { %3535 = vmatmul.mubr.msk.bf16.vlgmr.msra.gmra.mxu0 %vm825_vm1, %v2457_v22 }
 0x161   : > { %3545 = vmatpush3.bf16.msra.mxu0 %v3883_v3  ;;  %3546 = vmatprep.mubr.msk.bf16.mxu0 %vm3721_vm5, %v3720_v4  ;;  %v2502_v3 = vld [vmem:[#allocation2 + $0xe] sm:$0x1] }
 0x162   : > { %3556 = vmatprep.subr.bf16.mxu0 %v3720_v4  ;;  %v2506_v32 = vcombine.low %v2502_v3, %v2503_v30 }
 0x164   : > { %3517 = vmatmul.mubr.msk.bf16.vlgmr.msra.gmra.mxu1 %vm825_vm1, %v2268_v25  ;;  %v2513_v36 = vrot.slane %v2506_v32, %v4000_v11 }
 0x165   : > { %3527 = vmatpush3.bf16.msra.mxu1 %v4109_v52  ;;  %3528 = vmatprep.mubr.msk.bf16.mxu1 %vm3721_vm5, %v3720_v4 }
 0x166   : > { %3538 = vmatprep.subr.bf16.mxu1 %v3720_v4  ;;  %v2520_v37 = vrot.slane %v2513_v36, %v4000_v11 }
 0x168   : > { %3547 = vmatmul.mubr.msk.bf16.vlgmr.msra.gmra.mxu0 %vm825_vm1, %v1922_v61 }
 0x169   : > { %3557 = vmatpush3.bf16.msra.mxu0 %v4052_v15  ;;  %3558 = vmatprep.mubr.msk.bf16.mxu0 %vm3721_vm5, %v3720_v4  ;;  %v2733_v15 = vcombine.low %v2729_v33, %v2730_v34 }
 0x16a   : > { %3568 = vmatprep.subr.bf16.mxu0 %v3720_v4 }
 0x16b   : > { %v2740_v62 = vrot.slane %v2733_v15, %v4000_v11 }
 0x16c   : > { %3529 = vmatmul.mubr.msk.bf16.vlgmr.msra.gmra.mxu1 %vm825_vm1, %v2394_v31 }
 0x16d   : > { %3539 = vmatpush3.bf16.msra.mxu1 %v4145_v6  ;;  %3540 = vmatprep.mubr.msk.bf16.mxu1 %vm3721_vm5, %v3720_v4 }
 0x16e   : > { %3550 = vmatprep.subr.bf16.mxu1 %v3720_v4 }
 0x170   : > { %3559 = vmatmul.mubr.msk.bf16.vlgmr.msra.gmra.mxu0 %vm825_vm1, %v4213_v50 }
 0x171   : > { %3569 = vmatpush3.bf16.msra.mxu0 %v4079_v26  ;;  %3570 = vmatprep.mubr.msk.bf16.mxu0 %vm3721_vm5, %v3720_v4  ;;  %v2747_v26 = vrot.slane %v2740_v62, %v4000_v11 }
 0x172   : > { %3580 = vmatprep.subr.bf16.mxu0 %v3720_v4 }
 0x174   : > { %3541 = vmatmul.mubr.msk.bf16.vlgmr.msra.gmra.mxu1 %vm825_vm1, %v2520_v37 }
 0x175   : > { %3551 = vmatpush3.bf16.msra.mxu1 %v4018_v49  ;;  %3552 = vmatprep.mubr.msk.bf16.mxu1 %vm3721_vm5, %v3720_v4  ;;  %v2818_v49 = vshll.u32 %v2803_v41, 16 }
 0x176   : > { %3562 = vmatprep.subr.bf16.mxu1 %v3720_v4 }
 0x178   : > { %3571 = vmatmul.mubr.msk.bf16.vlgmr.msra.gmra.mxu0 %vm825_vm1, %v2747_v26 }
 0x179   : > { %3581 = vmatpush3.bf16.msra.mxu0 %v4109_v52  ;;  %3582 = vmatprep.mubr.msk.bf16.mxu0 %vm3721_vm5, %v3720_v4  ;;  %v2820_v52 = vsel %vm4114_vm2, %v2813_v43, %v2818_v49 }
 0x17a   : > { %3592 = vmatprep.subr.bf16.mxu0 %v3720_v4 }
 0x17c   : > { %3553 = vmatmul.mubr.msk.bf16.vlgmr.msra.gmra.mxu1 %vm825_vm1, %v4165_v19  ;;  %v2830_v19 = vcombine.low %v2820_v52, %v2829_v46 }
 0x17d   : > { %3563 = vmatpush3.bf16.msra.mxu1 %v3910_v20  ;;  %3564 = vmatprep.mubr.msk.bf16.mxu1 %vm3721_vm5, %v3720_v4 }
 0x17e   : > { %3574 = vmatprep.subr.bf16.mxu1 %v3720_v4  ;;  %v2837_v20 = vrot.slane %v2830_v19, %v4000_v11 }
 0x180   : > { %3583 = vmatmul.mubr.msk.bf16.vlgmr.msra.gmra.mxu0 %vm825_vm1, %v2520_v37  ;;  %v2844_v47 = vrot.slane %v2837_v20, %v4000_v11 }
 0x181   : > { %3593 = vmatpush3.bf16.msra.mxu0 %v4145_v6  ;;  %3594 = vmatprep.mubr.msk.bf16.mxu0 %vm3721_vm5, %v3720_v4  ;;  %v2930_v6 = vld [vmem:[#allocation2 + $0x14] sm:$0x1] }
 0x182   : > { %v2934_v48 = vcombine.low %v2930_v6, %v2931_v53 }
 0x184   : > { %3565 = vmatmul.mubr.msk.bf16.vlgmr.msra.gmra.mxu1 %vm825_vm1, %v4255_v14 }
 0x185   : > { %3575 = vmatpush3.bf16.msra.mxu1 %v4041_v5  ;;  %3576 = vmatprep.mubr.msk.bf16.mxu1 %vm3721_vm5, %v3720_v4  ;;  %v2941_v5 = vrot.slane %v2934_v48, %v4000_v11 }
 0x186   : > { %3586 = vmatprep.subr.bf16.mxu1 %v3720_v4 }
 0x187   : > { %v2948_v50 = vrot.slane %v2941_v5, %v4000_v11 }
 0x188   : > { %3595 = vmatmul.mubr.msk.bf16.vlgmr.msra.gmra.mxu0 %vm825_vm1, %v3045_v45 }
 0x18c   : > { %3577 = vmatmul.mubr.msk.bf16.vlgmr.msra.gmra.mxu1 %vm825_vm1, %v2844_v47 }
 0x18d   : > { %3587 = vmatpush3.bf16.msra.mxu1 %v4069_v21  ;;  %3588 = vmatprep.mubr.msk.bf16.mxu1 %vm3721_vm5, %v3720_v4  ;;  %vm3092_vm5 = vcmask 125952  }
 0x194   : > { %3589 = vmatmul.mubr.msk.bf16.vlgmr.msra.gmra.mxu1 %vm825_vm1, %v2948_v50 }
 0x1c4   : > { %v863_v60 = vpop.f32.mrf.mxu1 }
 0x1c6   : > { %v3386_v51 = vpop.f32.mrf.mxu1 }
 0x1c8   : > { %v866_v45 = vpop.f32.mrf.mxu1  ;;  %v1073_v54 = vpop.f32.mrf.mxu0 }
 0x1ca   : > { %v3387_v8 = vpop.f32.mrf.mxu1  ;;  %v3404_v23 = vpop.f32.mrf.mxu0 }
 0x1cc   : > { %v929_v56 = vpop.f32.mrf.mxu1  ;;  %v1076_v58 = vpop.f32.mrf.mxu0 }
 0x1cd   : > { %v930_v57 = vadd.f32 %v929_v56, %v863_v60 }
 0x1ce   : > { %v3392_v59 = vpop.f32.mrf.mxu1  ;;  %v3405_v21 = vpop.f32.mrf.mxu0 }
 0x1d0   : > { %v932_v61 = vpop.f32.mrf.mxu1  ;;  %v1217_v63 = vpop.f32.mrf.mxu0 }
 0x1d2   : > { %v3393_v4 = vpop.f32.mrf.mxu1  ;;  %v3416_v0 = vpop.f32.mrf.mxu0 }
 0x1d4   : > { %v1001_v1 = vpop.f32.mrf.mxu1  ;;  %v1220_v11 = vpop.f32.mrf.mxu0 }
 0x1d5   : > { %v1007_v2 = vadd.f32 %v1001_v1, %v930_v57 }
 0x1d6   : > { %v3398_v7 = vpop.f32.mrf.mxu1  ;;  %v3417_v9 = vpop.f32.mrf.mxu0 }
 0x1d7   : > { %v1079_v10 = vadd.f32 %v1073_v54, %v1007_v2 }
 0x1d8   : > { %v1004_v13 = vpop.f32.mrf.mxu1  ;;  %v1361_v14 = vpop.f32.mrf.mxu0 }
 0x1da   : > { %v3399_v35 = vpop.f32.mrf.mxu1  ;;  %v3428_v16 = vpop.f32.mrf.mxu0 }
 0x1db   : > { %v4351_v35 = vld [vmem:[%s4404_s4] ss:$0 sm:$0xff] }
 0x1dc   : > { %v1145_v17 = vpop.f32.mrf.mxu1  ;;  %v1364_v12 = vpop.f32.mrf.mxu0 }
 0x1dd   : > { %v1151_v40 = vadd.f32 %v1145_v17, %v1079_v10 }
 0x1de   : > { %v3410_v18 = vpop.f32.mrf.mxu1  ;;  %v3429_v22 = vpop.f32.mrf.mxu0 }
 0x1df   : > { %v1223_v55 = vadd.f32 %v1217_v63, %v1151_v40 }
 0x1e0   : > { %v1148_v24 = vpop.f32.mrf.mxu1  ;;  %v1504_v25 = vpop.f32.mrf.mxu0 }
 0x1e2   : > { %v3411_v27 = vpop.f32.mrf.mxu1  ;;  %v3440_v28 = vpop.f32.mrf.mxu0 }
 0x1e4   : > { %v1289_v30 = vpop.f32.mrf.mxu1  ;;  %v1507_v31 = vpop.f32.mrf.mxu0 }
 0x1e5   : > { %v1295_v3 = vadd.f32 %v1289_v30, %v1223_v55 }
 0x1e6   : > { %v3422_v32 = vpop.f32.mrf.mxu1  ;;  %v3441_v33 = vpop.f32.mrf.mxu0 }
 0x1e7   : > { %v1367_v34 = vadd.f32 %v1361_v14, %v1295_v3 }
 0x1e8   : > { %v1292_v36 = vpop.f32.mrf.mxu1  ;;  %v1655_v15 = vpop.f32.mrf.mxu0 }
 0x1ea   : > { %v3423_v37 = vpop.f32.mrf.mxu1  ;;  %v3452_v62 = vpop.f32.mrf.mxu0 }
 0x1ec   : > { %v1433_v38 = vpop.f32.mrf.mxu1  ;;  %v1658_v26 = vpop.f32.mrf.mxu0 }
 0x1ed   : > { %v1439_v39 = vadd.f32 %v1433_v38, %v1367_v34 }
 0x1ee   : > { %v3434_v41 = vpop.f32.mrf.mxu1  ;;  %v3453_v42 = vpop.f32.mrf.mxu0 }
 0x1ef   : > { %v4354_v18 = vadd.f32 %v4351_v35, %v1439_v39 }
 0x1f0   : > { %v1436_v43 = vpop.f32.mrf.mxu1  ;;  %v1759_v49 = vpop.f32.mrf.mxu0 }
 0x1f2   : > { %v3435_v29 = vpop.f32.mrf.mxu1  ;;  %v3464_v44 = vpop.f32.mrf.mxu0 }
 0x1f4   : > { %v1544_v52 = vpop.f32.mrf.mxu1  ;;  %v1762_v19 = vpop.f32.mrf.mxu0 }
 0x1f5   : > { %v1545_v46 = vadd.f32 %v1544_v52, %v1504_v25 }
 0x1f6   : > { %v3446_v20 = vpop.f32.mrf.mxu1  ;;  %v3465_v53 = vpop.f32.mrf.mxu0 }
 0x1f7   : > { %v1661_v6 = vadd.f32 %v1655_v15, %v1545_v46 }
 0x1f8   : > { %v1547_v47 = vpop.f32.mrf.mxu1  ;;  %v1897_v48 = vpop.f32.mrf.mxu0 }
 0x1fa   : > { %v3447_v5 = vpop.f32.mrf.mxu1  ;;  %v3476_v50 = vpop.f32.mrf.mxu0 }
 0x1fc   : > { %v1696_v60 = vpop.f32.mrf.mxu1  ;;  %v1900_v45 = vpop.f32.mrf.mxu0 }
 0x1fd   : > { %v1702_v51 = vadd.f32 %v1696_v60, %v1661_v6 }
 0x1fe   : > { %v3458_v54 = vpop.f32.mrf.mxu1  ;;  %v3477_v8 = vpop.f32.mrf.mxu0 }
 0x1ff   : > { %v1765_v23 = vadd.f32 %v1759_v49, %v1702_v51 }
 0x200   : > { %v1699_v56 = vpop.f32.mrf.mxu1  ;;  %v2057_v57 = vpop.f32.mrf.mxu0 }
 0x202   : > { %v3459_v58 = vpop.f32.mrf.mxu1  ;;  %v3488_v59 = vpop.f32.mrf.mxu0 }
 0x204   : > { %v1856_v21 = vpop.f32.mrf.mxu1  ;;  %v2060_v63 = vpop.f32.mrf.mxu0 }
 0x205   : > { %v1862_v61 = vadd.f32 %v1856_v21, %v1765_v23 }
 0x206   : > { %v3470_v4 = vpop.f32.mrf.mxu1  ;;  %v3489_v0 = vpop.f32.mrf.mxu0 }
 0x207   : > { %v1903_v1 = vadd.f32 %v1897_v48, %v1862_v61 }
 0x208   : > { %v1859_v2 = vpop.f32.mrf.mxu1  ;;  %v2140_v11 = vpop.f32.mrf.mxu0 }
 0x20a   : > { %v3471_v7 = vpop.f32.mrf.mxu1  ;;  %v3500_v9 = vpop.f32.mrf.mxu0 }
 0x20c   : > { %v1960_v10 = vpop.f32.mrf.mxu1  ;;  %v2143_v14 = vpop.f32.mrf.mxu0 }
 0x20d   : > { %v1966_v13 = vadd.f32 %v1960_v10, %v1903_v1 }
 0x20e   : > { %v3482_v16 = vpop.f32.mrf.mxu1  ;;  %v3501_v40 = vpop.f32.mrf.mxu0 }
 0x20f   : > { %v2063_v17 = vadd.f32 %v2057_v57, %v1966_v13 }
 0x210   : > { %v1963_v12 = vpop.f32.mrf.mxu1  ;;  %v2243_v55 = vpop.f32.mrf.mxu0 }
 0x211   : > { %v4357_v22 = vadd.f32 %v4351_v35, %v2063_v17 }
 0x212   : > { %v3483_v24 = vpop.f32.mrf.mxu1  ;;  %v3512_v25 = vpop.f32.mrf.mxu0 }
 0x213   : > { %v2065_v27 = vmax.f32 %v4354_v18, %v4357_v22 }
 0x214   : > { %v2100_v28 = vpop.f32.mrf.mxu1  ;;  %v2246_v30 = vpop.f32.mrf.mxu0 }
 0x215   : > { %v2141_v61 = vadd.f32 %v2140_v11, %v2100_v28 }
 0x216   : > { %v3494_v3 = vpop.f32.mrf.mxu1  ;;  %v3513_v31 = vpop.f32.mrf.mxu0 }
 0x218   : > { %v2103_v32 = vpop.f32.mrf.mxu1  ;;  %v2369_v33 = vpop.f32.mrf.mxu0 }
 0x21a   : > { %v3495_v34 = vpop.f32.mrf.mxu1  ;;  %v3524_v36 = vpop.f32.mrf.mxu0 }
 0x21c   : > { %v2180_v15 = vpop.f32.mrf.mxu1  ;;  %v2372_v37 = vpop.f32.mrf.mxu0 }
 0x21d   : > { %v2186_v0 = vadd.f32 %v2180_v15, %v2141_v61 }
 0x21e   : > { %v3506_v62 = vpop.f32.mrf.mxu1  ;;  %v3525_v38 = vpop.f32.mrf.mxu0 }
 0x21f   : > { %v2249_v10 = vadd.f32 %v2243_v55, %v2186_v0 }
 0x220   : > { %v2183_v39 = vpop.f32.mrf.mxu1  ;;  %v2495_v26 = vpop.f32.mrf.mxu0 }
 0x222   : > { %v3507_v41 = vpop.f32.mrf.mxu1  ;;  %v3536_v42 = vpop.f32.mrf.mxu0 }
 0x224   : > { %v2306_v43 = vpop.f32.mrf.mxu1  ;;  %v2498_v49 = vpop.f32.mrf.mxu0 }
 0x225   : > { %v2312_v17 = vadd.f32 %v2306_v43, %v2249_v10 }
 0x226   : > { %v3518_v29 = vpop.f32.mrf.mxu1  ;;  %v3537_v44 = vpop.f32.mrf.mxu0 }
 0x227   : > { %v2375_v3 = vadd.f32 %v2369_v33, %v2312_v17 }
 0x228   : > { %v2309_v52 = vpop.f32.mrf.mxu1  ;;  %v2601_v46 = vpop.f32.mrf.mxu0 }
 0x22a   : > { %v3519_v19 = vpop.f32.mrf.mxu1  ;;  %v3548_v20 = vpop.f32.mrf.mxu0 }
 0x22c   : > { %v2432_v53 = vpop.f32.mrf.mxu1  ;;  %v2604_v6 = vpop.f32.mrf.mxu0 }
 0x22d   : > { %v2438_v32 = vadd.f32 %v2432_v53, %v2375_v3 }
 0x22e   : > { %v3530_v47 = vpop.f32.mrf.mxu1  ;;  %v3549_v48 = vpop.f32.mrf.mxu0 }
 0x22f   : > { %v2501_v62 = vadd.f32 %v2495_v26, %v2438_v32 }
 0x230   : > { %v2435_v5 = vpop.f32.mrf.mxu1  ;;  %v2681_v50 = vpop.f32.mrf.mxu0 }
 0x232   : > { %v3531_v60 = vpop.f32.mrf.mxu1  ;;  %v3560_v51 = vpop.f32.mrf.mxu0 }
 0x234   : > { %v2558_v45 = vpop.f32.mrf.mxu1  ;;  %v2684_v54 = vpop.f32.mrf.mxu0 }
 0x235   : > { %v2564_v42 = vadd.f32 %v2558_v45, %v2501_v62 }
 0x236   : > { %v3542_v8 = vpop.f32.mrf.mxu1  ;;  %v3561_v23 = vpop.f32.mrf.mxu0 }
 0x237   : > { %v2565_v29 = vadd.f32 %v4351_v35, %v2564_v42 }
 0x238   : > { %v2561_v56 = vpop.f32.mrf.mxu1  ;;  %v2785_v57 = vpop.f32.mrf.mxu0 }
 0x239   : > { %v2566_v26 = vmax.f32 %v2065_v27, %v2565_v29 }
 0x23a   : > { %v3543_v58 = vpop.f32.mrf.mxu1  ;;  %v3572_v59 = vpop.f32.mrf.mxu0 }
 0x23c   : > { %v2641_v21 = vpop.f32.mrf.mxu1  ;;  %v2788_v63 = vpop.f32.mrf.mxu0 }
 0x23d   : > { %v2642_v13 = vadd.f32 %v2641_v21, %v2601_v46 }
 0x23e   : > { %v3554_v4 = vpop.f32.mrf.mxu1  ;;  %v3573_v1 = vpop.f32.mrf.mxu0 }
 0x23f   : > { %v2687_v24 = vadd.f32 %v2681_v50, %v2642_v13 }
 0x240   : > { %v2644_v2 = vpop.f32.mrf.mxu1  ;;  %v2923_v7 = vpop.f32.mrf.mxu0 }
 0x242   : > { %v3555_v9 = vpop.f32.mrf.mxu1  ;;  %v3584_v14 = vpop.f32.mrf.mxu0 }
 0x244   : > { %v2722_v16 = vpop.f32.mrf.mxu1  ;;  %v2926_v40 = vpop.f32.mrf.mxu0 }
 0x245   : > { %v2728_v11 = vadd.f32 %v2722_v16, %v2687_v24 }
 0x246   : > { %v3566_v12 = vpop.f32.mrf.mxu1  ;;  %v3585_v25 = vpop.f32.mrf.mxu0 }
 0x247   : > { %v2791_v15 = vadd.f32 %v2785_v57, %v2728_v11 }
 0x248   : > { %v2725_v30 = vpop.f32.mrf.mxu1  ;;  %v3083_v28 = vpop.f32.mrf.mxu0 }
 0x24a   : > { %v3567_v31 = vpop.f32.mrf.mxu1  ;;  %v3596_v34 = vpop.f32.mrf.mxu0 }
 0x24c   : > { %v2882_v36 = vpop.f32.mrf.mxu1  ;;  %v3086_v37 = vpop.f32.mrf.mxu0 }
 0x24d   : > { %v2888_v38 = vadd.f32 %v2882_v36, %v2791_v15 }
 0x24e   : > { %v3578_v55 = vpop.f32.mrf.mxu1  ;;  %v3597_v39 = vpop.f32.mrf.mxu0 }
 0x24f   : > { %v2929_v49 = vadd.f32 %v2923_v7, %v2888_v38 }
 0x250   : > { %v2885_v41 = vpop.f32.mrf.mxu1 }
 0x252   : > { %v3579_v43 = vpop.f32.mrf.mxu1 }
 0x254   : > { %v2986_v33 = vpop.f32.mrf.mxu1 }
 0x255   : > { %v2992_v44 = vadd.f32 %v2986_v33, %v2929_v49 }
 0x256   : > { %v3590_v52 = vpop.f32.mrf.mxu1 }
 0x257   : > { %v3089_v46 = vadd.f32 %v3083_v28, %v2992_v44 }
 0x258   : > { %v2989_v19 = vpop.f32.mrf.mxu1 }
 0x259   : > { %v3090_v20 = vadd.f32 %v4351_v35, %v3089_v46 }
 0x25a   : > { %v3591_v53 = vpop.f32.mrf.mxu1 }
 0x25b   : > { %v3091_v6 = vmax.f32 %v2566_v26, %v3090_v20 }
 0x25d   : > { %3093 = vst.msk [vmem:[%s217_s9] sm:$0xf] %vm3092_vm5, %v3091_v6 }
 0x25e   : > { %3671 = shalt.err (!%p3668_p3)
}
 0x25f   : > { %s3672_s23 = scalar_lea.hbm %s3106_s13, 64  ;;  %s3676_s30 = scalar_lea.hbm %s4405_s5, 128 }
 0x260   : > { %p3673_p4 = scmp.ne.s32.totalorder %s3106_s13, %s3672_s23  ;;  %p3677_p9 = scmp.lt.s32.totalorder %s3106_s13, %s4405_s5 }
 0x261   : > { %p3678_p10 = scmp.lt.s32.totalorder %s3676_s30, %s3672_s23 }
 0x262   : > { %p3674_p7 = pnand %p3673_p4, %p3793_p5 }
 0x263   : > { %p3679_p11 = por %p3678_p10, %p3677_p9 }
 0x264   : > { %p3675_p8 = pneg %p3674_p7 }
 0x266   : > { %p3680_p12 = pnand %p3679_p11, %p3675_p8 }
 0x268   : > { %3683 = shalt.err (!%p3680_p12)
}
 0x269   : > { %3599 = dma.vmem_to_hbm [thread:$0]  (%p3793_p5), %s3109_s10, 64, %s3106_s13, %s3095_s14  }
 0x26a PF: > { %p3605_p13 = scmp.ge.s32.totalorder %s3718_s21, 2  ;;  %s3120_s8 = sand.u32 1, %s3706_s18  }
 0x26b   : > { %s3121_s9 = scalar_lea.sflag [#allocation4], %s3120_s8 }
 0x26c   : > { %p3602_p0 = pnand %p3605_p13, %p3797_p6 }
 0x26e   : > { %p3603_p1 = pneg %p3602_p0 }
 0x270   : > { %3701 = dma.done.wait (%p3603_p1), %s3121_s9, 64  }
 0x271   : > { %3703 = vsyncadd (%p3603_p1), %s3121_s9, 4294967232  ;;  %p15_p2 = scmp.ge.s32.totalorder %s3780_s24, 4   ;;  %s4416_s18 = smov %s3710_s19 }
 0x272   : > { %s4417_s19 = smov %s3714_s20  ;;  %s4418_s20 = smov %s3791_s27 }
 0x273   : > { %s4419_s21 = smov %s3780_s24  ;;  %17 = sbr.rel (!%p15_p2) target bundleno = 3 (0x3), region = 118 }
 0x278   :  { %3126 = vsyncpa [#allocation4], 1 }
 0x279   :  { %3128 = vsyncpa [#allocation4 + $0x1], 1 }

</bundles_post_ra>
